<compile_context>
chip_gen: v7x
topology: tpu7x:2x2x1
jax: 0.10.0
libtpu: 0.0.40
codegen_flags: <defaults>
</compile_context>

<pallas_src>
import functools

import jax
import jax.numpy as jnp
from jax.experimental import pallas as pl
from jax.experimental.pallas import tpu as pltpu


# Spatial bookkeeping (28x28 input, valid 3x3 convs, one 2x2/2 maxpool).
_H = 28                  # input height / width
_P1 = 896                # flat spatial before pool: 28*28 = 784, padded to 7*128
_VW1 = 28                # virtual row stride before the pool
_P2 = 128                # flat spatial after pool: 11*11 = 121, padded to 128
_VW2 = 11                # virtual row stride after the pool
_BN_EPS = 1e-5
_MXU_DTYPE = jnp.bfloat16   # MXU operand dtype (accumulation stays f32)


def _round8(v):
    return (v + 7) // 8 * 8


# ----------------------------------------------------------------------------
# Fused kernel
# ----------------------------------------------------------------------------
def _conv3x3(a, w_ref, bias, vw):
    """Tap-stacked 3x3 valid conv + folded-BN bias + ReLU.

    a:     (Cin, P) f32 activations (channels on sublanes, flat spatial on lanes).
    w_ref: (Cout, 9*Cin) bf16 weights, tap-major / channel-minor, BN scale folded.
    bias:  (Cout, 1) f32.

    Valid outputs live at flat index p = y*vw + x inside the shrinking valid
    window; every other lane holds finite garbage that later stages never read.
    Each tap is one lane-roll (XLU); all 9 taps feed ONE MXU matmul (K = 9*Cin).
    """
    cin, p = a.shape
    taps = []
    for kh in range(3):
        for kw in range(3):
            s = kh * vw + kw
            taps.append(a if s == 0 else pltpu.roll(a, shift=(p - s) % p, axis=1))
    stacked = jnp.concatenate(taps, axis=0).astype(_MXU_DTYPE)      # (9*Cin, P)
    acc = jnp.dot(w_ref[...], stacked, preferred_element_type=jnp.float32)
    return jnp.maximum(acc + bias, 0.0)


def _conv1x1(a, w_ref, bias):
    acc = jnp.dot(w_ref[...], a.astype(_MXU_DTYPE),
                  preferred_element_type=jnp.float32)
    return jnp.maximum(acc + bias, 0.0)


def _net_kernel(x_ref, w1, w2, w3, w4, w5, w6,
                b_ref, head_ref, sel_ref, gapw_ref, o_ref,
                *, chans, boffs):
    b_all = b_ref[...]                                    # (Btot, 1) f32, packed

    def bias(i):                                          # static, 8-aligned slices
        return b_all[boffs[i]:boffs[i] + chans[i]]

    x = x_ref[...]                                        # (1, 896) f32
    a = _conv3x3(x, w1, bias(0), _VW1)                    # (n,   896)  valid 26x26
    a = _conv3x3(a, w2, bias(1), _VW1)                    # (2n,  896)  valid 24x24
    a = _conv3x3(a, w3, bias(2), _VW1)                    # (4n,  896)  valid 22x22

    # Fused 2x2/2 maxpool: two rolls (horizontal max, then vertical max of that),
    # then a 0/1 selection matmul that downsamples and re-packs to virtual width 11.
    m = jnp.maximum(a, pltpu.roll(a, shift=_P1 - 1, axis=1))
    m = jnp.maximum(m, pltpu.roll(m, shift=_P1 - _VW1, axis=1))
    a = jnp.dot(m.astype(_MXU_DTYPE), sel_ref[...],
                preferred_element_type=jnp.float32)       # (4n, 128)  11x11

    a = _conv1x1(a, w4, bias(3))                          # (n,  128)
    a = _conv3x3(a, w5, bias(4), _VW2)                    # (2n, 128)  valid 9x9
    a = _conv3x3(a, w6, bias(5), _VW2)                    # (4n, 128)  valid 7x7

    # GAP (masked mean over the valid 7x7) + 1x1 head, on the VPU/XLU (no MXU).
    g = jnp.sum(a * gapw_ref[...], axis=1, keepdims=True)        # (4n, 1)
    logits = jnp.sum(g * head_ref[...], axis=0, keepdims=True)   # (1, 10)

    zmax = jnp.max(logits, axis=-1, keepdims=True)
    z = logits - zmax
    lse = jnp.log(jnp.sum(jnp.exp(z), axis=-1, keepdims=True))
    o_ref[...] = z - lse                                          # log_softmax


# ----------------------------------------------------------------------------
# Wrapper
# ----------------------------------------------------------------------------
def _const_spec(shape):
    rank = len(shape)
    return pl.BlockSpec(shape, lambda b, _r=rank: (0,) * _r)


@jax.jit
def net_forward(x_nchw, params):
    n_batch = x_nchw.shape[0]
    assert x_nchw.shape[1:] == (1, _H, _H), x_nchw.shape
    # NCHW -> (N, 1, H*W), pad flat spatial to a multiple of 128 lanes.
    x_flat = jnp.pad(x_nchw.reshape(n_batch, 1, _H * _H),
                     ((0, 0), (0, 0), (0, _P1 - _H * _H)))

    kparams = list(params["kernel"])
    chans = tuple(int(w.shape[0]) for w in kparams[:6])   # per-layer Cout
    boffs, off = [], 0
    for c in chans:
        boffs.append(off)
        off += _round8(c)

    kernel = functools.partial(_net_kernel, chans=chans, boffs=tuple(boffs))

    in_specs = [pl.BlockSpec((None, 1, _P1), lambda b: (b, 0, 0))]
    in_specs += [_const_spec(arr.shape) for arr in kparams]

    out = pl.pallas_call(
        kernel,
        out_shape=jax.ShapeDtypeStruct((n_batch, 1, 10), jnp.float32),
        grid=(n_batch,),
        in_specs=in_specs,
        out_specs=pl.BlockSpec((None, 1, 10), lambda b: (b, 0, 0)),
        compiler_params=pltpu.CompilerParams(
            dimension_semantics=("parallel",)),   # v7x: batch split across 2 TCs
    )(x_flat, *kparams)
    # matches torch .squeeze() for batch > 1 (always returns (N, 10))
    return out[:, 0, :]


# ----------------------------------------------------------------------------
# Parameters (deterministic, synthetic) + packing for the kernel
# ----------------------------------------------------------------------------
def _pool_select_matrix():
    """(896, 128) 0/1 matrix: column y2*11+x2 selects flat position 56*y2+2*x2."""
    j = jnp.arange(_P2)
    y2, x2 = j // _VW2, j % _VW2
    target = 2 * y2 * _VW1 + 2 * x2
    valid = j < _VW2 * _VW2
    p = jnp.arange(_P1)
    return ((p[:, None] == target[None, :]) & valid[None, :]).astype(jnp.float32)


def _gap_weights():
    """(1, 128) weights: 1/49 over the valid 7x7 region (virtual width 11), else 0."""
    j = jnp.arange(_P2)
    y, x = j // _VW2, j % _VW2
    valid = (j < _VW2 * _VW2) & (y < 7) & (x < 7)
    return (valid.astype(jnp.float32) / 49.0).reshape(1, _P2)


def _pack_kernel_params(conv, head_w):
    """Pre-stack weights (BN scale folded, bf16) + one packed bias array."""
    weights, biases = [], []
    for (w, gamma, beta) in conv:
        kh, kw, cin, cout = w.shape
        # Inference-mode BN fold (running_mean = 0, running_var = 1).
        scale = gamma / jnp.sqrt(1.0 + _BN_EPS)
        # (kh,kw,cin,cout) -> (kh*kw*cin, cout): row = (kh*3+kw)*cin + c, which
        # matches the tap-major / channel-minor concat order in _conv3x3.
        wt = (w.reshape(kh * kw * cin, cout) * scale[None, :]).T   # (Cout, K)
        weights.append(wt.astype(_MXU_DTYPE))
        biases.append(beta)
    btot = sum(_round8(b.shape[0]) for b in biases)
    b_pack = jnp.zeros((btot, 1), jnp.float32)
    off = 0
    for b in biases:                       # each layer starts at an 8-aligned row
        b_pack = b_pack.at[off:off + b.shape[0], 0].set(b)
        off += _round8(b.shape[0])
    return weights + [b_pack, head_w,
                      _pool_select_matrix().astype(_MXU_DTYPE),
                      _gap_weights()]


def make_params(key, n=4):
    shapes = [  # (kh, kw, cin, cout) for convblocks 1..6
        (3, 3, 1, n), (3, 3, n, 2 * n), (3, 3, 2 * n, 4 * n),
        (1, 1, 4 * n, n), (3, 3, n, 2 * n), (3, 3, 2 * n, 4 * n),
    ]
    keys = jax.random.split(key, 2 * len(shapes) + 1)
    conv = []
    for i, (kh, kw, cin, cout) in enumerate(shapes):
        fan_in = kh * kw * cin
        w = (jax.random.normal(keys[2 * i], (kh, kw, cin, cout), jnp.float32)
             / jnp.sqrt(float(fan_in)))
        k1, k2 = jax.random.split(keys[2 * i + 1])
        gamma = 1.0 + 0.1 * jax.random.normal(k1, (cout,), jnp.float32)
        beta = 0.1 * jax.random.normal(k2, (cout,), jnp.float32)
        conv.append((w, gamma, beta))
    head_w = (jax.random.normal(keys[-1], (4 * n, 10), jnp.float32)
              / jnp.sqrt(float(4 * n)))
    return {"conv": conv, "head_w": head_w,
            "kernel": _pack_kernel_params(conv, head_w)}


# ----------------------------------------------------------------------------
# Pure-JAX reference (same inference-mode BN fold, full f32) for correctness
# ----------------------------------------------------------------------------
def _ref_block(h, w_hwio, gamma, beta):
    w_oihw = jnp.transpose(w_hwio, (3, 2, 0, 1))
    h = jax.lax.conv_general_dilated(
        h, w_oihw, window_strides=(1, 1), padding="VALID",
        dimension_numbers=("NCHW", "OIHW", "NCHW"),
        precision=jax.lax.Precision.HIGHEST)
    scale = (gamma / jnp.sqrt(1.0 + _BN_EPS))[None, :, None, None]
    bias = beta[None, :, None, None]
    return jnp.maximum(h * scale + bias, 0.0)


def ref_forward(x, params):
    c = params["conv"]
    h = _ref_block(x, *c[0])
    h = _ref_block(h, *c[1])
    h = _ref_block(h, *c[2])
    h = jax.lax.reduce_window(h, -jnp.inf, jax.lax.max,
                              (1, 1, 2, 2), (1, 1, 2, 2), "VALID")
    h = _ref_block(h, *c[3])
    h = _ref_block(h, *c[4])
    h = _ref_block(h, *c[5])
    g = jnp.mean(h, axis=(2, 3))                  # (N, 4n)
    logits = g @ params["head_w"]                 # (N, 10)
    return jax.nn.log_softmax(logits, axis=-1)


# ----------------------------------------------------------------------------
if __name__ == "__main__":
    key = jax.random.PRNGKey(0)
    k_x, k_p = jax.random.split(key)

    # NCHW input, same as the PyTorch module: (2, 1, 28, 28).
    x = jax.random.normal(k_x, (2, 1, 28, 28), jnp.float32)
    params = make_params(k_p, n=4)

    out = jax.block_until_ready(net_forward(x, params))

    assert out.shape == (2, 10), out.shape
    assert bool(jnp.all(jnp.isfinite(out)))
    # log_softmax rows should sum (in prob space) to ~1.
    assert jnp.allclose(jnp.sum(jnp.exp(out), axis=-1), 1.0, atol=1e-4)
    # Match the pure-JAX f32 reference (kernel uses bf16 MXU operands with f32
    # accumulation, so the tolerance is slightly looser than the f32-only version).
    ref = ref_forward(x, params)
    assert jnp.allclose(out, ref, atol=3e-2, rtol=3e-2), \
        float(jnp.max(jnp.abs(out - ref)))

    print("KERNEL_OK")
</pallas_src>

<mosaic_0001>
module attributes {stable_mosaic.version = 11 : i64} {
  func.func @_net_kernel(%arg0: i32, %arg1: memref<1x1x896xf32, #tpu.memory_space<vmem>>, %arg2: memref<4x9xbf16, #tpu.memory_space<vmem>>, %arg3: memref<8x36xbf16, #tpu.memory_space<vmem>>, %arg4: memref<16x72xbf16, #tpu.memory_space<vmem>>, %arg5: memref<4x16xbf16, #tpu.memory_space<vmem>>, %arg6: memref<8x36xbf16, #tpu.memory_space<vmem>>, %arg7: memref<16x72xbf16, #tpu.memory_space<vmem>>, %arg8: memref<64x1xf32, #tpu.memory_space<vmem>>, %arg9: memref<16x10xf32, #tpu.memory_space<vmem>>, %arg10: memref<896x128xbf16, #tpu.memory_space<vmem>>, %arg11: memref<1x128xf32, #tpu.memory_space<vmem>>, %arg12: memref<1x1x10xf32, #tpu.memory_space<vmem>>) attributes {dimension_semantics = [#tpu.dimension_semantics<parallel>], iteration_bounds = array<i64: 2>, scalar_prefetch = 0 : i64, scratch_operands = 0 : i64, tpu.core_type = #tpu.core_type<tc>, window_params = [{transform_indices = @transform_0, window_bounds = array<i64: 1, 1, 896>}, {pipeline_mode = #tpu.pipeline_mode<synchronous>, transform_indices = @transform_1, window_bounds = array<i64: 4, 9>}, {pipeline_mode = #tpu.pipeline_mode<synchronous>, transform_indices = @transform_2, window_bounds = array<i64: 8, 36>}, {pipeline_mode = #tpu.pipeline_mode<synchronous>, transform_indices = @transform_3, window_bounds = array<i64: 16, 72>}, {pipeline_mode = #tpu.pipeline_mode<synchronous>, transform_indices = @transform_4, window_bounds = array<i64: 4, 16>}, {pipeline_mode = #tpu.pipeline_mode<synchronous>, transform_indices = @transform_5, window_bounds = array<i64: 8, 36>}, {pipeline_mode = #tpu.pipeline_mode<synchronous>, transform_indices = @transform_6, window_bounds = array<i64: 16, 72>}, {pipeline_mode = #tpu.pipeline_mode<synchronous>, transform_indices = @transform_7, window_bounds = array<i64: 64, 1>}, {pipeline_mode = #tpu.pipeline_mode<synchronous>, transform_indices = @transform_8, window_bounds = array<i64: 16, 10>}, {pipeline_mode = #tpu.pipeline_mode<synchronous>, transform_indices = @transform_9, window_bounds = array<i64: 896, 128>}, {pipeline_mode = #tpu.pipeline_mode<synchronous>, transform_indices = @transform_10, window_bounds = array<i64: 1, 128>}, {transform_indices = @transform_11, window_bounds = array<i64: 1, 1, 10>}]} {
    %c0 = arith.constant 0 : index
    %c0_0 = arith.constant 0 : index
    %0 = vector.load %arg8[%c0, %c0_0] : memref<64x1xf32, #tpu.memory_space<vmem>>, vector<64x1xf32>
    %c0_1 = arith.constant 0 : index
    %c0_2 = arith.constant 0 : index
    %c0_3 = arith.constant 0 : index
    %1 = vector.load %arg1[%c0_1, %c0_2, %c0_3] : memref<1x1x896xf32, #tpu.memory_space<vmem>>, vector<1x1x896xf32>
    %2 = vector.shape_cast %1 : vector<1x1x896xf32> to vector<1x896xf32>
    %3 = vector.extract_strided_slice %0 {offsets = [0, 0], sizes = [4, 1], strides = [1, 1]} : vector<64x1xf32> to vector<4x1xf32>
    %c895_i32 = arith.constant 895 : i32
    %4 = tpu.dynamic_rotate %2 by %c895_i32 dim 1 : vector<1x896xf32>, i32 -> vector<1x896xf32>
    %c894_i32 = arith.constant 894 : i32
    %5 = tpu.dynamic_rotate %2 by %c894_i32 dim 1 : vector<1x896xf32>, i32 -> vector<1x896xf32>
    %c868_i32 = arith.constant 868 : i32
    %6 = tpu.dynamic_rotate %2 by %c868_i32 dim 1 : vector<1x896xf32>, i32 -> vector<1x896xf32>
    %c867_i32 = arith.constant 867 : i32
    %7 = tpu.dynamic_rotate %2 by %c867_i32 dim 1 : vector<1x896xf32>, i32 -> vector<1x896xf32>
    %c866_i32 = arith.constant 866 : i32
    %8 = tpu.dynamic_rotate %2 by %c866_i32 dim 1 : vector<1x896xf32>, i32 -> vector<1x896xf32>
    %c840_i32 = arith.constant 840 : i32
    %9 = tpu.dynamic_rotate %2 by %c840_i32 dim 1 : vector<1x896xf32>, i32 -> vector<1x896xf32>
    %c839_i32 = arith.constant 839 : i32
    %10 = tpu.dynamic_rotate %2 by %c839_i32 dim 1 : vector<1x896xf32>, i32 -> vector<1x896xf32>
    %c838_i32 = arith.constant 838 : i32
    %11 = tpu.dynamic_rotate %2 by %c838_i32 dim 1 : vector<1x896xf32>, i32 -> vector<1x896xf32>
    %12 = tpu.concatenate %2, %4, %5, %6, %7, %8, %9, %10, %11 in 0 : vector<1x896xf32>, vector<1x896xf32>, vector<1x896xf32>, vector<1x896xf32>, vector<1x896xf32>, vector<1x896xf32>, vector<1x896xf32>, vector<1x896xf32>, vector<1x896xf32> -> vector<9x896xf32>
    %13 = arith.truncf %12 : vector<9x896xf32> to vector<9x896xbf16>
    %c0_4 = arith.constant 0 : index
    %c0_5 = arith.constant 0 : index
    %14 = vector.load %arg2[%c0_4, %c0_5] : memref<4x9xbf16, #tpu.memory_space<vmem>>, vector<4x9xbf16>
    %cst = arith.constant dense<0.000000e+00> : vector<4x896xf32>
    %15 = tpu.matmul %14, %13, %cst {dimension_numbers = #tpu.dot_dimension_numbers<[1], [0], [0], [1], [0, 0, 1, 1], [], []>} : vector<4x9xbf16>, vector<9x896xbf16>, vector<4x896xf32> -> vector<4x896xf32>
    %16 = vector.broadcast %3 : vector<4x1xf32> to vector<4x896xf32>
    %17 = arith.addf %15, %16 : vector<4x896xf32>
    %cst_6 = arith.constant 0.000000e+00 : f32
    %18 = vector.broadcast %cst_6 : f32 to vector<4x896xf32>
    %19 = arith.maximumf %17, %18 : vector<4x896xf32>
    %20 = vector.extract_strided_slice %0 {offsets = [8, 0], sizes = [8, 1], strides = [1, 1]} : vector<64x1xf32> to vector<8x1xf32>
    %c895_i32_7 = arith.constant 895 : i32
    %21 = tpu.dynamic_rotate %19 by %c895_i32_7 dim 1 : vector<4x896xf32>, i32 -> vector<4x896xf32>
    %c894_i32_8 = arith.constant 894 : i32
    %22 = tpu.dynamic_rotate %19 by %c894_i32_8 dim 1 : vector<4x896xf32>, i32 -> vector<4x896xf32>
    %c868_i32_9 = arith.constant 868 : i32
    %23 = tpu.dynamic_rotate %19 by %c868_i32_9 dim 1 : vector<4x896xf32>, i32 -> vector<4x896xf32>
    %c867_i32_10 = arith.constant 867 : i32
    %24 = tpu.dynamic_rotate %19 by %c867_i32_10 dim 1 : vector<4x896xf32>, i32 -> vector<4x896xf32>
    %c866_i32_11 = arith.constant 866 : i32
    %25 = tpu.dynamic_rotate %19 by %c866_i32_11 dim 1 : vector<4x896xf32>, i32 -> vector<4x896xf32>
    %c840_i32_12 = arith.constant 840 : i32
    %26 = tpu.dynamic_rotate %19 by %c840_i32_12 dim 1 : vector<4x896xf32>, i32 -> vector<4x896xf32>
    %c839_i32_13 = arith.constant 839 : i32
    %27 = tpu.dynamic_rotate %19 by %c839_i32_13 dim 1 : vector<4x896xf32>, i32 -> vector<4x896xf32>
    %c838_i32_14 = arith.constant 838 : i32
    %28 = tpu.dynamic_rotate %19 by %c838_i32_14 dim 1 : vector<4x896xf32>, i32 -> vector<4x896xf32>
    %29 = tpu.concatenate %19, %21, %22, %23, %24, %25, %26, %27, %28 in 0 : vector<4x896xf32>, vector<4x896xf32>, vector<4x896xf32>, vector<4x896xf32>, vector<4x896xf32>, vector<4x896xf32>, vector<4x896xf32>, vector<4x896xf32>, vector<4x896xf32> -> vector<36x896xf32>
    %30 = arith.truncf %29 : vector<36x896xf32> to vector<36x896xbf16>
    %c0_15 = arith.constant 0 : index
    %c0_16 = arith.constant 0 : index
    %31 = vector.load %arg3[%c0_15, %c0_16] : memref<8x36xbf16, #tpu.memory_space<vmem>>, vector<8x36xbf16>
    %cst_17 = arith.constant dense<0.000000e+00> : vector<8x896xf32>
    %32 = tpu.matmul %31, %30, %cst_17 {dimension_numbers = #tpu.dot_dimension_numbers<[1], [0], [0], [1], [0, 0, 1, 1], [], []>} : vector<8x36xbf16>, vector<36x896xbf16>, vector<8x896xf32> -> vector<8x896xf32>
    %33 = vector.broadcast %20 : vector<8x1xf32> to vector<8x896xf32>
    %34 = arith.addf %32, %33 : vector<8x896xf32>
    %cst_18 = arith.constant 0.000000e+00 : f32
    %35 = vector.broadcast %cst_18 : f32 to vector<8x896xf32>
    %36 = arith.maximumf %34, %35 : vector<8x896xf32>
    %37 = vector.extract_strided_slice %0 {offsets = [16, 0], sizes = [16, 1], strides = [1, 1]} : vector<64x1xf32> to vector<16x1xf32>
    %c895_i32_19 = arith.constant 895 : i32
    %38 = tpu.dynamic_rotate %36 by %c895_i32_19 dim 1 : vector<8x896xf32>, i32 -> vector<8x896xf32>
    %c894_i32_20 = arith.constant 894 : i32
    %39 = tpu.dynamic_rotate %36 by %c894_i32_20 dim 1 : vector<8x896xf32>, i32 -> vector<8x896xf32>
    %c868_i32_21 = arith.constant 868 : i32
    %40 = tpu.dynamic_rotate %36 by %c868_i32_21 dim 1 : vector<8x896xf32>, i32 -> vector<8x896xf32>
    %c867_i32_22 = arith.constant 867 : i32
    %41 = tpu.dynamic_rotate %36 by %c867_i32_22 dim 1 : vector<8x896xf32>, i32 -> vector<8x896xf32>
    %c866_i32_23 = arith.constant 866 : i32
    %42 = tpu.dynamic_rotate %36 by %c866_i32_23 dim 1 : vector<8x896xf32>, i32 -> vector<8x896xf32>
    %c840_i32_24 = arith.constant 840 : i32
    %43 = tpu.dynamic_rotate %36 by %c840_i32_24 dim 1 : vector<8x896xf32>, i32 -> vector<8x896xf32>
    %c839_i32_25 = arith.constant 839 : i32
    %44 = tpu.dynamic_rotate %36 by %c839_i32_25 dim 1 : vector<8x896xf32>, i32 -> vector<8x896xf32>
    %c838_i32_26 = arith.constant 838 : i32
    %45 = tpu.dynamic_rotate %36 by %c838_i32_26 dim 1 : vector<8x896xf32>, i32 -> vector<8x896xf32>
    %46 = tpu.concatenate %36, %38, %39, %40, %41, %42, %43, %44, %45 in 0 : vector<8x896xf32>, vector<8x896xf32>, vector<8x896xf32>, vector<8x896xf32>, vector<8x896xf32>, vector<8x896xf32>, vector<8x896xf32>, vector<8x896xf32>, vector<8x896xf32> -> vector<72x896xf32>
    %47 = arith.truncf %46 : vector<72x896xf32> to vector<72x896xbf16>
    %c0_27 = arith.constant 0 : index
    %c0_28 = arith.constant 0 : index
    %48 = vector.load %arg4[%c0_27, %c0_28] : memref<16x72xbf16, #tpu.memory_space<vmem>>, vector<16x72xbf16>
    %cst_29 = arith.constant dense<0.000000e+00> : vector<16x896xf32>
    %49 = tpu.matmul %48, %47, %cst_29 {dimension_numbers = #tpu.dot_dimension_numbers<[1], [0], [0], [1], [0, 0, 1, 1], [], []>} : vector<16x72xbf16>, vector<72x896xbf16>, vector<16x896xf32> -> vector<16x896xf32>
    %50 = vector.broadcast %37 : vector<16x1xf32> to vector<16x896xf32>
    %51 = arith.addf %49, %50 : vector<16x896xf32>
    %cst_30 = arith.constant 0.000000e+00 : f32
    %52 = vector.broadcast %cst_30 : f32 to vector<16x896xf32>
    %53 = arith.maximumf %51, %52 : vector<16x896xf32>
    %c895_i32_31 = arith.constant 895 : i32
    %54 = tpu.dynamic_rotate %53 by %c895_i32_31 dim 1 : vector<16x896xf32>, i32 -> vector<16x896xf32>
    %55 = arith.maximumf %53, %54 : vector<16x896xf32>
    %c868_i32_32 = arith.constant 868 : i32
    %56 = tpu.dynamic_rotate %55 by %c868_i32_32 dim 1 : vector<16x896xf32>, i32 -> vector<16x896xf32>
    %57 = arith.maximumf %55, %56 : vector<16x896xf32>
    %58 = arith.truncf %57 : vector<16x896xf32> to vector<16x896xbf16>
    %c0_33 = arith.constant 0 : index
    %c0_34 = arith.constant 0 : index
    %59 = vector.load %arg10[%c0_33, %c0_34] : memref<896x128xbf16, #tpu.memory_space<vmem>>, vector<896x128xbf16>
    %cst_35 = arith.constant dense<0.000000e+00> : vector<16x128xf32>
    %60 = tpu.matmul %58, %59, %cst_35 {dimension_numbers = #tpu.dot_dimension_numbers<[1], [0], [0], [1], [0, 0, 1, 1], [], []>} : vector<16x896xbf16>, vector<896x128xbf16>, vector<16x128xf32> -> vector<16x128xf32>
    %61 = vector.extract_strided_slice %0 {offsets = [32, 0], sizes = [4, 1], strides = [1, 1]} : vector<64x1xf32> to vector<4x1xf32>
    %c0_36 = arith.constant 0 : index
    %c0_37 = arith.constant 0 : index
    %62 = vector.load %arg5[%c0_36, %c0_37] : memref<4x16xbf16, #tpu.memory_space<vmem>>, vector<4x16xbf16>
    %63 = arith.truncf %60 : vector<16x128xf32> to vector<16x128xbf16>
    %cst_38 = arith.constant dense<0.000000e+00> : vector<4x128xf32>
    %64 = tpu.matmul %62, %63, %cst_38 {dimension_numbers = #tpu.dot_dimension_numbers<[1], [0], [0], [1], [0, 0, 1, 1], [], []>} : vector<4x16xbf16>, vector<16x128xbf16>, vector<4x128xf32> -> vector<4x128xf32>
    %65 = vector.broadcast %61 : vector<4x1xf32> to vector<4x128xf32>
    %66 = arith.addf %64, %65 : vector<4x128xf32>
    %cst_39 = arith.constant 0.000000e+00 : f32
    %67 = vector.broadcast %cst_39 : f32 to vector<4x128xf32>
    %68 = arith.maximumf %66, %67 : vector<4x128xf32>
    %69 = vector.extract_strided_slice %0 {offsets = [40, 0], sizes = [8, 1], strides = [1, 1]} : vector<64x1xf32> to vector<8x1xf32>
    %c127_i32 = arith.constant 127 : i32
    %70 = tpu.dynamic_rotate %68 by %c127_i32 dim 1 : vector<4x128xf32>, i32 -> vector<4x128xf32>
    %c126_i32 = arith.constant 126 : i32
    %71 = tpu.dynamic_rotate %68 by %c126_i32 dim 1 : vector<4x128xf32>, i32 -> vector<4x128xf32>
    %c117_i32 = arith.constant 117 : i32
    %72 = tpu.dynamic_rotate %68 by %c117_i32 dim 1 : vector<4x128xf32>, i32 -> vector<4x128xf32>
    %c116_i32 = arith.constant 116 : i32
    %73 = tpu.dynamic_rotate %68 by %c116_i32 dim 1 : vector<4x128xf32>, i32 -> vector<4x128xf32>
    %c115_i32 = arith.constant 115 : i32
    %74 = tpu.dynamic_rotate %68 by %c115_i32 dim 1 : vector<4x128xf32>, i32 -> vector<4x128xf32>
    %c106_i32 = arith.constant 106 : i32
    %75 = tpu.dynamic_rotate %68 by %c106_i32 dim 1 : vector<4x128xf32>, i32 -> vector<4x128xf32>
    %c105_i32 = arith.constant 105 : i32
    %76 = tpu.dynamic_rotate %68 by %c105_i32 dim 1 : vector<4x128xf32>, i32 -> vector<4x128xf32>
    %c104_i32 = arith.constant 104 : i32
    %77 = tpu.dynamic_rotate %68 by %c104_i32 dim 1 : vector<4x128xf32>, i32 -> vector<4x128xf32>
    %78 = tpu.concatenate %68, %70, %71, %72, %73, %74, %75, %76, %77 in 0 : vector<4x128xf32>, vector<4x128xf32>, vector<4x128xf32>, vector<4x128xf32>, vector<4x128xf32>, vector<4x128xf32>, vector<4x128xf32>, vector<4x128xf32>, vector<4x128xf32> -> vector<36x128xf32>
    %79 = arith.truncf %78 : vector<36x128xf32> to vector<36x128xbf16>
    %c0_40 = arith.constant 0 : index
    %c0_41 = arith.constant 0 : index
    %80 = vector.load %arg6[%c0_40, %c0_41] : memref<8x36xbf16, #tpu.memory_space<vmem>>, vector<8x36xbf16>
    %cst_42 = arith.constant dense<0.000000e+00> : vector<8x128xf32>
    %81 = tpu.matmul %80, %79, %cst_42 {dimension_numbers = #tpu.dot_dimension_numbers<[1], [0], [0], [1], [0, 0, 1, 1], [], []>} : vector<8x36xbf16>, vector<36x128xbf16>, vector<8x128xf32> -> vector<8x128xf32>
    %82 = vector.broadcast %69 : vector<8x1xf32> to vector<8x128xf32>
    %83 = arith.addf %81, %82 : vector<8x128xf32>
    %cst_43 = arith.constant 0.000000e+00 : f32
    %84 = vector.broadcast %cst_43 : f32 to vector<8x128xf32>
    %85 = arith.maximumf %83, %84 : vector<8x128xf32>
    %86 = vector.extract_strided_slice %0 {offsets = [48, 0], sizes = [16, 1], strides = [1, 1]} : vector<64x1xf32> to vector<16x1xf32>
    %c127_i32_44 = arith.constant 127 : i32
    %87 = tpu.dynamic_rotate %85 by %c127_i32_44 dim 1 : vector<8x128xf32>, i32 -> vector<8x128xf32>
    %c126_i32_45 = arith.constant 126 : i32
    %88 = tpu.dynamic_rotate %85 by %c126_i32_45 dim 1 : vector<8x128xf32>, i32 -> vector<8x128xf32>
    %c117_i32_46 = arith.constant 117 : i32
    %89 = tpu.dynamic_rotate %85 by %c117_i32_46 dim 1 : vector<8x128xf32>, i32 -> vector<8x128xf32>
    %c116_i32_47 = arith.constant 116 : i32
    %90 = tpu.dynamic_rotate %85 by %c116_i32_47 dim 1 : vector<8x128xf32>, i32 -> vector<8x128xf32>
    %c115_i32_48 = arith.constant 115 : i32
    %91 = tpu.dynamic_rotate %85 by %c115_i32_48 dim 1 : vector<8x128xf32>, i32 -> vector<8x128xf32>
    %c106_i32_49 = arith.constant 106 : i32
    %92 = tpu.dynamic_rotate %85 by %c106_i32_49 dim 1 : vector<8x128xf32>, i32 -> vector<8x128xf32>
    %c105_i32_50 = arith.constant 105 : i32
    %93 = tpu.dynamic_rotate %85 by %c105_i32_50 dim 1 : vector<8x128xf32>, i32 -> vector<8x128xf32>
    %c104_i32_51 = arith.constant 104 : i32
    %94 = tpu.dynamic_rotate %85 by %c104_i32_51 dim 1 : vector<8x128xf32>, i32 -> vector<8x128xf32>
    %95 = tpu.concatenate %85, %87, %88, %89, %90, %91, %92, %93, %94 in 0 : vector<8x128xf32>, vector<8x128xf32>, vector<8x128xf32>, vector<8x128xf32>, vector<8x128xf32>, vector<8x128xf32>, vector<8x128xf32>, vector<8x128xf32>, vector<8x128xf32> -> vector<72x128xf32>
    %96 = arith.truncf %95 : vector<72x128xf32> to vector<72x128xbf16>
    %c0_52 = arith.constant 0 : index
    %c0_53 = arith.constant 0 : index
    %97 = vector.load %arg7[%c0_52, %c0_53] : memref<16x72xbf16, #tpu.memory_space<vmem>>, vector<16x72xbf16>
    %cst_54 = arith.constant dense<0.000000e+00> : vector<16x128xf32>
    %98 = tpu.matmul %97, %96, %cst_54 {dimension_numbers = #tpu.dot_dimension_numbers<[1], [0], [0], [1], [0, 0, 1, 1], [], []>} : vector<16x72xbf16>, vector<72x128xbf16>, vector<16x128xf32> -> vector<16x128xf32>
    %99 = vector.broadcast %86 : vector<16x1xf32> to vector<16x128xf32>
    %100 = arith.addf %98, %99 : vector<16x128xf32>
    %cst_55 = arith.constant 0.000000e+00 : f32
    %101 = vector.broadcast %cst_55 : f32 to vector<16x128xf32>
    %102 = arith.maximumf %100, %101 : vector<16x128xf32>
    %c0_56 = arith.constant 0 : index
    %c0_57 = arith.constant 0 : index
    %103 = vector.load %arg11[%c0_56, %c0_57] : memref<1x128xf32, #tpu.memory_space<vmem>>, vector<1x128xf32>
    %104 = vector.broadcast %103 : vector<1x128xf32> to vector<16x128xf32>
    %105 = arith.mulf %102, %104 : vector<16x128xf32>
    %cst_58 = arith.constant dense<0.000000e+00> : vector<16xf32>
    %106 = vector.multi_reduction <add>, %105, %cst_58 [1] : vector<16x128xf32> to vector<16xf32>
    %107 = vector.shape_cast %106 : vector<16xf32> to vector<16x1xf32>
    %c0_59 = arith.constant 0 : index
    %c0_60 = arith.constant 0 : index
    %108 = vector.load %arg9[%c0_59, %c0_60] : memref<16x10xf32, #tpu.memory_space<vmem>>, vector<16x10xf32>
    %109 = vector.broadcast %107 : vector<16x1xf32> to vector<16x10xf32>
    %110 = arith.mulf %109, %108 : vector<16x10xf32>
    %cst_61 = arith.constant dense<0.000000e+00> : vector<10xf32>
    %111 = vector.multi_reduction <add>, %110, %cst_61 [0] : vector<16x10xf32> to vector<10xf32>
    %112 = vector.shape_cast %111 : vector<10xf32> to vector<1x10xf32>
    %cst_62 = arith.constant dense<0xFF800000> : vector<1xf32>
    %113 = vector.multi_reduction <maximumf>, %112, %cst_62 [1] : vector<1x10xf32> to vector<1xf32>
    %114 = vector.shape_cast %113 : vector<1xf32> to vector<1x1xf32>
    %115 = vector.broadcast %114 : vector<1x1xf32> to vector<1x10xf32>
    %116 = arith.subf %112, %115 : vector<1x10xf32>
    %117 = math.exp %116 : vector<1x10xf32>
    %cst_63 = arith.constant dense<0.000000e+00> : vector<1xf32>
    %118 = vector.multi_reduction <add>, %117, %cst_63 [1] : vector<1x10xf32> to vector<1xf32>
    %119 = vector.shape_cast %118 : vector<1xf32> to vector<1x1xf32>
    %120 = math.log %119 : vector<1x1xf32>
    %121 = vector.broadcast %120 : vector<1x1xf32> to vector<1x10xf32>
    %122 = arith.subf %116, %121 : vector<1x10xf32>
    %c0_64 = arith.constant 0 : index
    %c0_65 = arith.constant 0 : index
    %c0_66 = arith.constant 0 : index
    %123 = vector.load %arg12[%c0_64, %c0_65, %c0_66] : memref<1x1x10xf32, #tpu.memory_space<vmem>>, vector<1x1x10xf32>
    %124 = vector.shape_cast %123 : vector<1x1x10xf32> to vector<1x10xf32>
    %125 = vector.shape_cast %122 : vector<1x10xf32> to vector<1x1x10xf32>
    tpu.vector_store %arg12[%c0_64, %c0_65, %c0_66], %125 {strides = array<i32>} : memref<1x1x10xf32, #tpu.memory_space<vmem>>, vector<1x1x10xf32>,
    return
  }
  func.func @transform_0(%arg0: i32) -> (i32, i32, i32) {
    %c0_i32 = arith.constant 0 : i32
    %c0_i32_0 = arith.constant 0 : i32
    %c0_i32_1 = arith.constant 0 : i32
    return %arg0, %c0_i32, %c0_i32_0 : i32, i32, i32
  }
  func.func @transform_1(%arg0: i32) -> (i32, i32) {
    %c0_i32 = arith.constant 0 : i32
    %c0_i32_0 = arith.constant 0 : i32
    %c0_i32_1 = arith.constant 0 : i32
    return %c0_i32, %c0_i32_0 : i32, i32
  }
  func.func @transform_2(%arg0: i32) -> (i32, i32) {
    %c0_i32 = arith.constant 0 : i32
    %c0_i32_0 = arith.constant 0 : i32
    %c0_i32_1 = arith.constant 0 : i32
    return %c0_i32, %c0_i32_0 : i32, i32
  }
  func.func @transform_3(%arg0: i32) -> (i32, i32) {
    %c0_i32 = arith.constant 0 : i32
    %c0_i32_0 = arith.constant 0 : i32
    %c0_i32_1 = arith.constant 0 : i32
    return %c0_i32, %c0_i32_0 : i32, i32
  }
  func.func @transform_4(%arg0: i32) -> (i32, i32) {
    %c0_i32 = arith.constant 0 : i32
    %c0_i32_0 = arith.constant 0 : i32
    %c0_i32_1 = arith.constant 0 : i32
    return %c0_i32, %c0_i32_0 : i32, i32
  }
  func.func @transform_5(%arg0: i32) -> (i32, i32) {
    %c0_i32 = arith.constant 0 : i32
    %c0_i32_0 = arith.constant 0 : i32
    %c0_i32_1 = arith.constant 0 : i32
    return %c0_i32, %c0_i32_0 : i32, i32
  }
  func.func @transform_6(%arg0: i32) -> (i32, i32) {
    %c0_i32 = arith.constant 0 : i32
    %c0_i32_0 = arith.constant 0 : i32
    %c0_i32_1 = arith.constant 0 : i32
    return %c0_i32, %c0_i32_0 : i32, i32
  }
  func.func @transform_7(%arg0: i32) -> (i32, i32) {
    %c0_i32 = arith.constant 0 : i32
    %c0_i32_0 = arith.constant 0 : i32
    %c0_i32_1 = arith.constant 0 : i32
    return %c0_i32, %c0_i32_0 : i32, i32
  }
  func.func @transform_8(%arg0: i32) -> (i32, i32) {
    %c0_i32 = arith.constant 0 : i32
    %c0_i32_0 = arith.constant 0 : i32
    %c0_i32_1 = arith.constant 0 : i32
    return %c0_i32, %c0_i32_0 : i32, i32
  }
  func.func @transform_9(%arg0: i32) -> (i32, i32) {
    %c0_i32 = arith.constant 0 : i32
    %c0_i32_0 = arith.constant 0 : i32
    %c0_i32_1 = arith.constant 0 : i32
    return %c0_i32, %c0_i32_0 : i32, i32
  }
  func.func @transform_10(%arg0: i32) -> (i32, i32) {
    %c0_i32 = arith.constant 0 : i32
    %c0_i32_0 = arith.constant 0 : i32
    %c0_i32_1 = arith.constant 0 : i32
    return %c0_i32, %c0_i32_0 : i32, i32
  }
  func.func @transform_11(%arg0: i32) -> (i32, i32, i32) {
    %c0_i32 = arith.constant 0 : i32
    %c0_i32_0 = arith.constant 0 : i32
    %c0_i32_1 = arith.constant 0 : i32
    return %arg0, %c0_i32, %c0_i32_0 : i32, i32, i32
  }
}

</mosaic_0001>

<bundles_post_ra>
// kernel: net_forward.1
= control target key start
LH: loop header
LB: loop body
LE: loop exit
PB: predicated region body
PF: predicated region fallthrough
CT: control target
= control target key end

     0   :  { %16 = vsyncpa [#allocation3], 0  ;;  %s5695_s0 = inlined_call_operand.vmem [shape: f32[2,1,896], index: 0, kind: input, shape index: {}]   ;;  %s5696_s1 = inlined_call_operand.vmem [shape: bf16[4,9], index: 1, kind: input, shape index: {}]   ;;  %s5697_s2 = inlined_call_operand.vmem [shape: bf16[8,36], index: 2, kind: input, shape index: {}]   ;;  %s5698_s3 = inlined_call_operand.vmem [shape: bf16[16,72], index: 3, kind: input, shape index: {}]   ;;  %s5699_s4 = inlined_call_operand.vmem [shape: bf16[4,16], index: 4, kind: input, shape index: {}]   ;;  %s5700_s5 = inlined_call_operand.vmem [shape: bf16[8,36], index: 5, kind: input, shape index: {}]   ;;  %s5701_s6 = inlined_call_operand.vmem [shape: bf16[16,72], index: 6, kind: input, shape index: {}]   ;;  %s5702_s7 = inlined_call_operand.vmem [shape: f32[64,1], index: 7, kind: input, shape index: {}]   ;;  %s5703_s8 = inlined_call_operand.vmem [shape: f32[16,10], index: 8, kind: input, shape index: {}]   ;;  %s5704_s9 = inlined_call_operand.hbm [shape: bf16[896,128], index: 9, kind: input, shape index: {}]   ;;  %s5705_s10 = inlined_call_operand.vmem [shape: f32[1,128], index: 10, kind: input, shape index: {}]   ;;  %s5706_s11 = inlined_call_operand.hbm [shape: f32[2,1,10], index: 11, kind: output, shape index: {}]  }
   0x1   :  { %17 = vsyncpa [#allocation4], 0 }
   0x2   :  { %19 = vsyncpa [#allocation4 + $0x1], 0  ;;  %s4054_s17 = smov 0   ;;  %s4056_s18 = smov 0  }
   0x3   :  { %s4058_s19 = smov 0   ;;  %s4060_s20 = smov 0  }
   0x4 LB: > { %s4075_s21 = sadd.s32 4294967295, %s3970_s20   ;;  %s3043_s22 = sadd.s32 4294967294, %s3970_s20   ;;  %s3970_s20 = sphi %s4060_s20, %s5732_s20   ;;  %s3966_s19 = sphi %s4058_s19, %s5731_s19   ;;  %s3962_s18 = sphi %s4056_s18, %s5730_s18   ;;  %s3958_s17 = sphi %s4054_s17, %s5729_s17  }
   0x5   : > { %s4079_s23 = sadd.s32 1, %s3970_s20   ;;  %s268_s24 = sadd.s32 1, %s3966_s19 }
   0x6   : > { %s265_s25 = ssub.s32 %s3970_s20, %s4079_s23  ;;  %p278_p0 = scmp.ne.s32.totalorder %s3966_s19, %s3962_s18 }
   0x7   : > { %p266_p1 = scmp.eq.s32.totalorder %s265_s25, 0  ;;  %p279_p2 = scmp.eq.s32.totalorder %s4075_s21, 1 }
   0x8   : > { %p284_p3 = scmp.ne.s32.totalorder %s3962_s18, %s3958_s17  ;;  %p285_p4 = scmp.eq.s32.totalorder %s3043_s22, 1 }
   0x9   : > { %s4090_s26 = scalar_select %p266_p1, %s3966_s19, %s268_s24  }
   0xa   : > { %p4092_p5 = por %p279_p2, %p278_p0  ;;  %p4096_p6 = por %p285_p4, %p284_p3 }
   0xb   : > { %5715 = sst [smem:[#allocation8_spill]] %s4090_s26  ;;  %p3044_p7 = scmp.ge.s32.totalorder %s3970_s20, 1 }
   0xc   : > { %s5716_s27 = scalar_select %p4092_p5, 1, 0 }
   0xd   : > { %s5717_s28 = scalar_select %p4096_p6, 1, 0 }
   0xe   : > { %p292_p8 = scmp.lt.s32.totalorder %s3970_s20, 3  ;;  %p5707_p9 = scmp.eq.s32.totalorder %s4075_s21, 0 }
   0xf   : > { %s3972_s30 = smov [#allocation2]   ;;  %s3876_s16 = scalar_lea.hbm %s5704_s9, 7168 }
  0x10   : > { %p4103_p10 = pnand %p3044_p7, %p292_p8  ;;  %s328_s12 = sshll.u32 %s3972_s30, 4  ;;  %s329_s12 = int_to_ptr.vmem [resolvable:$true] %s328_s12 }
  0x11   : > { %p3877_p13 = scmp.ne.s32.totalorder %s5704_s9, %s3876_s16  ;;  %p3883_p3 = scmp.lt.u32.totalorder %s3876_s16, %s5704_s9 }
  0x12   : > { %s5718_s29 = scalar_select %p4103_p10, 1, 0 }
  0x13   : > { %p3318_p11 = pneg %p4103_p10 }
  0x15   : > { %p4111_p12 = pnand %p5707_p9, %p3318_p11 }
  0x17   : > { %p3878_p0 = pneg %p4111_p12 }
  0x19   : > { %p3879_p1 = pnand %p3878_p0, %p3877_p13 }
  0x1b   : > { %p3880_p2 = pneg %p3879_p1 }
  0x1d   : > { %p3885_p4 = pnand %p3883_p3, %p3880_p2 }
  0x1f   : > { %3888 = shalt.err (!%p3885_p4)
}
  0x20   : > { %s3889_s26 = scalar_lea.vmem %s329_s12, 7168  ;;  %p3897_p9 = scmp.lt.s32.totalorder %s329_s12, %s329_s12 }
  0x21   : > { %p3890_p7 = scmp.ne.s32.totalorder %s329_s12, %s3889_s26  ;;  %p3898_p6 = scmp.lt.s32.totalorder %s3889_s26, %s3889_s26 }
  0x23   : > { %p3892_p8 = pnand %p3890_p7, %p3878_p0  ;;  %p3899_p5 = por %p3898_p6, %p3897_p9 }
  0x25   : > { %p3893_p11 = pneg %p3892_p8 }
  0x27   : > { %p3900_p10 = pnand %p3899_p5, %p3893_p11 }
  0x29   : > { %3903 = shalt.err (!%p3900_p10)
}
  0x2a   : > { %s3973_s14 = smov 64   ;;  %s3974_s15 = smov 4  }
  0x2b   : > { %3321 = dma.hbm_to_vmem [thread:$0]  (!%p4111_p12), %s5704_s9, 7168, %s329_s12, [#allocation3], %s3973_s14, %s3973_s14, %s3974_s15  }
  0x2c   : > { %p5720_p13 = scmp.ne.s32.totalorder %s5718_s29, 0 }
  0x2d   : > { %p5721_p1 = scmp.eq.s32.totalorder (!%p5720_p13), %s4075_s21, 0 }
  0x2e   : > { %354 = sbr.rel (%p5720_p13) target bundleno = 3183 (0xc6f), region = 64 }
  0x35   : > { %3949 = dma.done.wait (%p5721_p1), [#allocation3], 7168   ;;  %p5722_p0 = pmov %p5721_p1 }
  0x36   : > { %p392_p5 = scmp.lt.s32.totalorder %s4075_s21, 1  ;;  %v407_v0 = vlaneseq  ;;  %s3975_s25 = smov 126   ;;  %v5710_v20 = vmov 0   ;;  %v397_v23 = vld [vmem:[%s5702_s7] sm:$0xff]  ;;  %vm767_vm2 = vcmask 1040384   ;;  %vm791_vm7 = vcmask 1043456  }
  0x37   : > { %3951 = vsyncadd (%p5722_p0), [#allocation3], 4294960128  ;;  %s3976_s30 = smov 127   ;;  %s3977_s14 = smov 100   ;;  %895 = vmatprep.mubr.bf16.mxu1 %v5710_v20  ;;  %977 = vmatprep.mubr.bf16.mxu0 %v5710_v20  ;;  %vm775_vm8 = vcmask 1041408   ;;  %vm799_vm9 = vcmask 1044480  }
  0x38   : > { %s393_s26 = scalar_select %p392_p5, %s4075_s21, 1  ;;  %v408_v1 = vshrl.u32 %v407_v0, 7  ;;  %3502 = vset.pattern.permute.xlu0 %v5710_v20  ;;  %3743 = vset.pattern.permute.xlu1 %v5710_v20  ;;  %v4215_v26 = vand.u32 127, %v407_v0  ;;  %v3984_v46 = vmov 65535   ;;  %vm783_vm11 = vcmask 1042432  }
  0x39   : > { %s3978_s15 = smov 99   ;;  %s3979_s22 = smov 98   ;;  %v840_v47 = vsel %vm791_vm7, 4294967295, %v3984_v46  ;;  %vm807_vm12 = vcmask 1045504   ;;  %vm815_vm13 = vcmask 1046528   ;;  %vm836_vm15 = vcmask 72704  }
  0x3a   : > { %s3311_s13 = smul.u32 7, %s393_s26  ;;  %v413_v2 = vsub.s32 1, %v408_v1  ;;  %v417_v3 = vsub.s32 2, %v408_v1  ;;  %v409_v4 = vsub.s32 0, %v408_v1  ;;  %v421_v5 = vsub.s32 3, %v408_v1  ;;  %s3980_s24 = smov 72  }
  0x3b   : > { %v425_v13 = vsub.s32 4, %v408_v1  ;;  %v429_v14 = vsub.s32 5, %v408_v1  ;;  %v433_v15 = vsub.s32 6, %v408_v1  ;;  %s3981_s26 = smov 71   ;;  %vm458_vm0 = vcmp.lt.s32.totalorder %v4215_v26, 127  ;;  %s3987_s12 = smov 117  }
  0x3c   : > { %s395_s29 = scalar_lea.vmem %s5695_s0, %s3311_s13  ;;  %s3982_s13 = smov 70   ;;  %vm480_vm1 = vcmp.lt.s32.totalorder %v4215_v26, 126  ;;  %vm502_vm3 = vcmp.lt.s32.totalorder %v4215_v26, 100  ;;  %vm524_vm4 = vcmp.lt.s32.totalorder %v4215_v26, 99  ;;  %vm546_vm5 = vcmp.lt.s32.totalorder %v4215_v26, 98 }
  0x3d   : > { %v405_v6 = vld [vmem:[%s395_s29] sm:$0xff]  ;;  %vm568_vm6 = vcmp.lt.s32.totalorder %v4215_v26, 72  ;;  %vm590_vm10 = vcmp.lt.s32.totalorder %v4215_v26, 71  ;;  %vm612_vm14 = vcmp.lt.s32.totalorder %v4215_v26, 70  ;;  %s3988_s16 = smov 115   ;;  %s390_s29 = sand.u32 1, %s3962_s18  }
  0x3e   : > { %v4143_v7 = vrot.slane %v405_v6, %v413_v2  ;;  %v4145_v8 = vrot.slane %v405_v6, %v417_v3  ;;  %v4147_v9 = vrot.slane %v405_v6, %v409_v4  ;;  %v4149_v10 = vrot.slane %v405_v6, %v421_v5  ;;  %p5726_p9 = scmp.ne.s32.totalorder %s5716_s27, 0 }
  0x3f   : > { %v4165_v16 = vrot.slane %v405_v6, %v425_v13  ;;  %v4169_v17 = vrot.slane %v405_v6, %v429_v14  ;;  %v4173_v18 = vrot.slane %v405_v6, %v433_v15 }
  0x40   : > { %v3392_v11 = vpack.i.bf16 %v4145_v8, %v4143_v7  ;;  %v3397_v12 = vpack.i.bf16 %v4149_v10, %v4147_v9 }
  0x41   : > { %v3452_v19 = vpack.i.bf16 %v4169_v17, %v4165_v16  ;;  %v3497_v21 = vpack.i.bf16 %v4173_v18, %v4169_v17  ;;  %v3492_v22 = vpack.i.bf16 %v4165_v16, %v4149_v10 }
  0x42   : > { %3393 = vrot.lane.b32.xlu1 %v3392_v11, %s3975_s25  ;;  %3383 = vrot.lane.b32.xlu0 %v3392_v11, %s3976_s30 }
  0x46   : > { %3398 = vrot.lane.b32.xlu1 %v3397_v12, %s3975_s25  ;;  %3388 = vrot.lane.b32.xlu0 %v3397_v12, %s3976_s30 }
  0x4a   : > { %3408 = vrot.lane.b32.xlu1 %v3397_v12, %s3977_s14  ;;  %3403 = vrot.lane.b32.xlu0 %v3392_v11, %s3977_s14 }
  0x4e   : > { %3418 = vrot.lane.b32.xlu1 %v3397_v12, %s3978_s15  ;;  %3413 = vrot.lane.b32.xlu0 %v3392_v11, %s3978_s15 }
  0x52   : > { %3428 = vrot.lane.b32.xlu1 %v3397_v12, %s3979_s22  ;;  %3423 = vrot.lane.b32.xlu0 %v3392_v11, %s3979_s22 }
  0x56   : > { %3438 = vrot.lane.b32.xlu1 %v3397_v12, %s3980_s24  ;;  %3433 = vrot.lane.b32.xlu0 %v3392_v11, %s3980_s24 }
  0x5a   : > { %3448 = vrot.lane.b32.xlu1 %v3397_v12, %s3981_s26  ;;  %3443 = vrot.lane.b32.xlu0 %v3392_v11, %s3981_s26 }
  0x5e   : > { %454 = vrot.lane.b32.xlu1 %v4173_v18, %s3976_s30  ;;  %3453 = vrot.lane.b32.xlu0 %v3452_v19, %s3976_s30 }
  0x62   : > { %3463 = vrot.lane.b32.xlu1 %v3392_v11, %s3982_s13  ;;  %3458 = vrot.lane.b32.xlu0 %v3452_v19, %s3975_s25 }
  0x66   : > { %3468 = vrot.lane.b32.xlu1 %v3452_v19, %s3977_s14  ;;  %478 = vrot.lane.b32.xlu0 %v4173_v18, %s3975_s25 }
  0x6a   : > { %500 = vrot.lane.b32.xlu1 %v4173_v18, %s3977_s14  ;;  %598 = vrot.lane.b32.xlu0 %v4147_v9, %s3982_s13 }
  0x6e   : > { %522 = vrot.lane.b32.xlu1 %v4173_v18, %s3978_s15  ;;  %3473 = vrot.lane.b32.xlu0 %v3452_v19, %s3978_s15 }
  0x72   : > { %544 = vrot.lane.b32.xlu1 %v4173_v18, %s3979_s22  ;;  %3478 = vrot.lane.b32.xlu0 %v3452_v19, %s3979_s22 }
  0x76   : > { %566 = vrot.lane.b32.xlu1 %v4173_v18, %s3980_s24  ;;  %3483 = vrot.lane.b32.xlu0 %v3452_v19, %s3980_s24 }
  0x7a   : > { %588 = vrot.lane.b32.xlu1 %v4173_v18, %s3981_s26  ;;  %3488 = vrot.lane.b32.xlu0 %v3452_v19, %s3981_s26 }
  0x7e   : > { %3498 = vrot.lane.b32.xlu1 %v3497_v21, %s3982_s13  ;;  %3493 = vrot.lane.b32.xlu0 %v3492_v22, %s3982_s13 }
  0x82   : > { %833 = vperm.xlu0 %3502, %v397_v23  }
  0xb4   : > { %v3394_v24 = vpop.permute.xlu1 %3393  ;;  %v3384_v25 = vpop.permute.xlu0 %3383 }
  0xb5   : > { %v3386_v29 = vunpack.i.h.bf16 %v3384_v25  ;;  %v3385_v30 = vunpack.i.l.bf16 %v3384_v25  ;;  %v3396_v34 = vunpack.i.h.bf16 %v3394_v24  ;;  %v3395_v35 = vunpack.i.l.bf16 %v3394_v24 }
  0xb7   : > { %v463_v36 = vsel %vm458_vm0, %v3385_v30, %v3386_v29  ;;  %v485_v42 = vsel %vm480_vm1, %v3395_v35, %v3396_v34 }
  0xb8   : > { %v4217_v27 = vpop.permute.xlu1 %3398  ;;  %v4219_v28 = vpop.permute.xlu0 %3388  ;;  %v628_v43 = vrot.slane %v463_v36, 7  ;;  %v649_v54 = vrot.slane %v485_v42, 6 }
  0xb9   : > { %v3390_v33 = vunpack.i.l.bf16 %v4219_v28  ;;  %v3391_v37 = vunpack.i.h.bf16 %v4219_v28  ;;  %v3400_v38 = vunpack.i.l.bf16 %v4217_v27  ;;  %v3401_v44 = vunpack.i.h.bf16 %v4217_v27 }
  0xba   : > { %v769_v58 = vsel %vm767_vm2, %v4143_v7, %v628_v43  ;;  %v4272_v7 = vsel %vm799_vm9, %v840_v47, 0 }
  0xbb   : > { %v464_v41 = vsel %vm458_vm0, %v3390_v33, %v3385_v30  ;;  %v462_v45 = vsel %vm458_vm0, %v3386_v29, %v3391_v37  ;;  %v486_v48 = vsel %vm480_vm1, %v3400_v38, %v3395_v35  ;;  %v484_v59 = vsel %vm480_vm1, %v3396_v34, %v3401_v44 }
  0xbc   : > { %v4222_v31 = vpop.permute.xlu1 %3408  ;;  %v3404_v32 = vpop.permute.xlu0 %3403  ;;  %v627_v49 = vrot.slane %v464_v41, 7  ;;  %v629_v60 = vrot.slane %v462_v45, 7  ;;  %v648_v62 = vrot.slane %v486_v48, 6  ;;  %v650_v14 = vrot.slane %v484_v59, 6 }
  0xbd   : > { %v3406_v50 = vunpack.i.h.bf16 %v3404_v32  ;;  %v3405_v51 = vunpack.i.l.bf16 %v3404_v32  ;;  %v3411_v55 = vunpack.i.h.bf16 %v4222_v31  ;;  %v3410_v61 = vunpack.i.l.bf16 %v4222_v31 }
  0xbe   : > { %v768_v2 = vsel %vm767_vm2, %v4147_v9, %v627_v49  ;;  %v770_v15 = vsel %vm767_vm2, %v4145_v8, %v629_v60  ;;  %v777_v21 = vsel %vm775_vm8, %v769_v58, %v649_v54 }
  0xbf   : > { %v507_v3 = vsel %vm502_vm3, %v3405_v51, %v3406_v50  ;;  %v506_v11 = vsel %vm502_vm3, %v3406_v50, %v3411_v55  ;;  %v508_v19 = vsel %vm502_vm3, %v3410_v61, %v3405_v51  ;;  %v776_v23 = vsel %vm775_vm8, %v768_v2, %v648_v62 }
  0xc0   : > { %v4230_v39 = vpop.permute.xlu1 %3418  ;;  %v3414_v40 = vpop.permute.xlu0 %3413  ;;  %v670_v22 = vrot.slane %v507_v3, 5  ;;  %v671_v8 = vrot.slane %v506_v11, 5  ;;  %v669_v43 = vrot.slane %v508_v19, 5  ;;  %v778_v45 = vsel %vm775_vm8, %v770_v15, %v650_v14 }
  0xc1   : > { %v3416_v56 = vunpack.i.h.bf16 %v3414_v40  ;;  %v3415_v57 = vunpack.i.l.bf16 %v3414_v40  ;;  %v3421_v63 = vunpack.i.h.bf16 %v4230_v39  ;;  %v3420_v4 = vunpack.i.l.bf16 %v4230_v39 }
  0xc2   : > { %v785_v51 = vsel %vm783_vm11, %v777_v21, %v670_v22 }
  0xc3   : > { %v529_v12 = vsel %vm524_vm4, %v3415_v57, %v3416_v56  ;;  %v528_v24 = vsel %vm524_vm4, %v3416_v56, %v3421_v63  ;;  %v530_v29 = vsel %vm524_vm4, %v3420_v4, %v3415_v57 }
  0xc4   : > { %v4253_v52 = vpop.permute.xlu1 %3428  ;;  %v3424_v53 = vpop.permute.xlu0 %3423  ;;  %v691_v30 = vrot.slane %v529_v12, 4  ;;  %v692_v46 = vrot.slane %v528_v24, 4  ;;  %v690_v54 = vrot.slane %v530_v29, 4 }
  0xc5   : > { %v3426_v0 = vunpack.i.h.bf16 %v3424_v53  ;;  %v3425_v1 = vunpack.i.l.bf16 %v3424_v53  ;;  %v3431_v32 = vunpack.i.h.bf16 %v4253_v52  ;;  %v3430_v36 = vunpack.i.l.bf16 %v4253_v52 }
  0xc6   : > { %v786_v53 = vsel %vm783_vm11, %v778_v45, %v671_v8  ;;  %v793_v59 = vsel %vm791_vm7, %v785_v51, %v691_v30 }
  0xc7   : > { %v551_v25 = vsel %vm546_vm5, %v3425_v1, %v3426_v0  ;;  %v550_v60 = vsel %vm546_vm5, %v3426_v0, %v3431_v32  ;;  %v552_v62 = vsel %vm546_vm5, %v3430_v36, %v3425_v1  ;;  %v794_v11 = vsel %vm791_vm7, %v786_v53, %v692_v46 }
  0xc8   : > { %v4269_v5 = vpop.permute.xlu1 %3438  ;;  %v3434_v6 = vpop.permute.xlu0 %3433  ;;  %v712_v47 = vrot.slane %v551_v25, 3  ;;  %v713_v21 = vrot.slane %v550_v60, 3  ;;  %v711_v22 = vrot.slane %v552_v62, 3 }
  0xc9   : > { %v3436_v9 = vunpack.i.h.bf16 %v3434_v6  ;;  %v3435_v13 = vunpack.i.l.bf16 %v3434_v6  ;;  %v3441_v48 = vunpack.i.h.bf16 %v4269_v5  ;;  %v3440_v49 = vunpack.i.l.bf16 %v4269_v5 }
  0xca   : > { %v784_v6 = vsel %vm783_vm11, %v776_v23, %v669_v43  ;;  %v801_v14 = vsel %vm799_vm9, %v793_v59, %v712_v47 }
  0xcb   : > { %v573_v40 = vsel %vm568_vm6, %v3435_v13, %v3436_v9  ;;  %v572_v0 = vsel %vm568_vm6, %v3436_v9, %v3441_v48  ;;  %v574_v1 = vsel %vm568_vm6, %v3440_v49, %v3435_v13  ;;  %v792_v8 = vsel %vm791_vm7, %v784_v6, %v690_v54 }
  0xcc   : > { %v4300_v34 = vpop.permute.xlu1 %3448  ;;  %v3444_v35 = vpop.permute.xlu0 %3443  ;;  %v733_v56 = vrot.slane %v573_v40, 2  ;;  %v732_v40 = vrot.slane %v574_v1, 2  ;;  %v800_v28 = vsel %vm799_vm9, %v792_v8, %v711_v22 }
  0xcd   : > { %v3446_v41 = vunpack.i.h.bf16 %v3444_v35  ;;  %v3445_v42 = vunpack.i.l.bf16 %v3444_v35  ;;  %v3451_v2 = vunpack.i.h.bf16 %v4300_v34  ;;  %v3450_v3 = vunpack.i.l.bf16 %v4300_v34 }
  0xce   : > { %v809_v25 = vsel %vm807_vm12, %v801_v14, %v733_v56  ;;  %v734_v35 = vrot.slane %v572_v0, 2 }
  0xcf   : > { %v595_v50 = vsel %vm590_vm10, %v3445_v42, %v3446_v41  ;;  %v594_v9 = vsel %vm590_vm10, %v3446_v41, %v3451_v2  ;;  %v596_v13 = vsel %vm590_vm10, %v3450_v3, %v3445_v42 }
  0xd0   : > { %v455_v57 = vpop.permute.xlu1 %454  ;;  %v3454_v58 = vpop.permute.xlu0 %3453  ;;  %v754_v12 = vrot.slane %v595_v50, 1  ;;  %v755_v50 = vrot.slane %v594_v9, 1  ;;  %v753_v51 = vrot.slane %v596_v13, 1 }
  0xd1   : > { %v3456_v15 = vunpack.i.h.bf16 %v3454_v58  ;;  %v3455_v19 = vunpack.i.l.bf16 %v3454_v58  ;;  %v465_v43 = vsel %vm458_vm0, %v455_v57, %v3390_v33  ;;  %v802_v58 = vsel %vm799_vm9, %v794_v11, %v713_v21 }
  0xd2   : > { %v817_v45 = vsel %vm815_vm13, %v809_v25, %v754_v12  ;;  %v633_v59 = vrot.slane %v465_v43, 7  ;;  %v810_v6 = vsel %vm807_vm12, %v802_v58, %v734_v35  ;;  %v4427_v58 = vld [vmem:[%s5696_s1] sm:$0x3] }
  0xd3   : > { %v460_v41 = vsel %vm458_vm0, %v3455_v19, %v3456_v15  ;;  %v461_v42 = vsel %vm458_vm0, %v3391_v37, %v3455_v19  ;;  %v808_v37 = vsel %vm807_vm12, %v800_v28, %v732_v40  ;;  %v459_v12 = vsel %vm458_vm0, %v3456_v15, %v455_v57 }
  0xd4   : > { %v4334_v23 = vpop.permute.xlu1 %3463  ;;  %v3459_v24 = vpop.permute.xlu0 %3458  ;;  %v630_v60 = vrot.slane %v461_v42, 7  ;;  %v631_v62 = vrot.slane %v460_v41, 7  ;;  %v4380_v57 = vsel %vm815_vm13, %v810_v6, %v755_v50  ;;  %v774_v15 = vsel %vm767_vm2, %v4173_v18, %v633_v59 }
  0xd5   : > { %v3466_v29 = vunpack.i.h.bf16 %v4334_v23  ;;  %v3465_v30 = vunpack.i.l.bf16 %v4334_v23  ;;  %v3460_v46 = vunpack.i.l.bf16 %v3459_v24  ;;  %v3461_v53 = vunpack.i.h.bf16 %v3459_v24 }
  0xd6   : > { %v816_v24 = vsel %vm815_vm13, %v808_v37, %v753_v51  ;;  %v632_v9 = vrot.slane %v459_v12, 7  ;;  %v771_v13 = vsel %vm767_vm2, %v4149_v10, %v630_v60  ;;  %v772_v18 = vsel %vm767_vm2, %v4165_v16, %v631_v62 }
  0xd7   : > { %v617_v47 = vsel %vm612_vm14, %v3465_v30, %v3466_v29  ;;  %v483_v14 = vsel %vm480_vm1, %v3401_v44, %v3460_v46  ;;  %v482_v1 = vsel %vm480_vm1, %v3460_v46, %v3461_v53 }
  0xd8   : > { %v3469_v33 = vpop.permute.xlu1 %3468  ;;  %v479_v54 = vpop.permute.xlu0 %478  ;;  %v824_v56 = vpack.c.bf16 %v617_v47, %v817_v45  ;;  %v651_v35 = vrot.slane %v483_v14, 6  ;;  %v652_v40 = vrot.slane %v482_v1, 6  ;;  %v773_v51 = vsel %vm767_vm2, %v4169_v17, %v632_v9 }
  0xd9   : > { %v3470_v0 = vunpack.i.l.bf16 %v3469_v33  ;;  %v3471_v19 = vunpack.i.h.bf16 %v3469_v33  ;;  %v481_v44 = vsel %vm480_vm1, %v3461_v53, %v479_v54  ;;  %v487_v25 = vsel %vm480_vm1, %v479_v54, %v3400_v38 }
  0xda   : > { %v846_v11 = vand.u32 %v4272_v7, %v824_v56  ;;  %v653_v10 = vrot.slane %v481_v44, 6  ;;  %v654_v45 = vrot.slane %v487_v25, 6  ;;  %v779_v47 = vsel %vm775_vm8, %v771_v13, %v651_v35 }
  0xdb   : > { %v505_v27 = vsel %vm502_vm3, %v3411_v55, %v3470_v0  ;;  %v504_v43 = vsel %vm502_vm3, %v3470_v0, %v3471_v19  ;;  %v780_v33 = vsel %vm775_vm8, %v772_v18, %v652_v40  ;;  %vm3986_vm2 = vmmov 0  }
  0xdc   : > { %v501_v21 = vpop.permute.xlu1 %500  ;;  %v4376_v22 = vpop.permute.xlu0 %598  ;;  %863 = vmatprep.subr.bf16.mxu1 %v846_v11  ;;  %v672_v50 = vrot.slane %v505_v27, 5  ;;  %v673_v54 = vrot.slane %v504_v43, 5  ;;  %v781_v17 = vsel %vm775_vm8, %v773_v51, %v653_v10  ;;  %v782_v39 = vsel %vm775_vm8, %v774_v15, %v654_v45 }
  0xdd   : > { %v618_v8 = vsel %vm612_vm14, %v4376_v22, %v3465_v30  ;;  %v509_v38 = vsel %vm502_vm3, %v501_v21, %v3410_v61  ;;  %v503_v16 = vsel %vm502_vm3, %v3471_v19, %v501_v21 }
  0xde   : > { %v823_v30 = vpack.c.bf16 %v618_v8, %v816_v24  ;;  %v675_v53 = vrot.slane %v509_v38, 5  ;;  %v674_v59 = vrot.slane %v503_v16, 5  ;;  %v787_v14 = vsel %vm783_vm11, %v779_v47, %v672_v50 }
  0xdf   : > { %v788_v15 = vsel %vm783_vm11, %v780_v33, %v673_v54 }
  0xe0   : > { %v523_v41 = vpop.permute.xlu1 %522  ;;  %v3474_v42 = vpop.permute.xlu0 %3473  ;;  %v843_v61 = vand.u32 %v4272_v7, %v823_v30  ;;  %v790_v0 = vsel %vm783_vm11, %v782_v39, %v675_v53  ;;  %v789_v44 = vsel %vm783_vm11, %v781_v17, %v674_v59  ;;  %vm1755_vm11 = vcmask 588800  }
  0xe1   : > { %v531_v55 = vsel %vm524_vm4, %v523_v41, %v3420_v4  ;;  %v3476_v31 = vunpack.i.h.bf16 %v3474_v42  ;;  %v3475_v46 = vunpack.i.l.bf16 %v3474_v42 }
  0xe2   : > { %864 = vmatpush1.bf16.msra.mxu1 %v843_v61  ;;  %v696_v28 = vrot.slane %v531_v55, 4 }
  0xe3   : > { %v525_v56 = vsel %vm524_vm4, %v3476_v31, %v523_v41  ;;  %v527_v4 = vsel %vm524_vm4, %v3421_v63, %v3475_v46  ;;  %v526_v60 = vsel %vm524_vm4, %v3475_v46, %v3476_v31 }
  0xe4   : > { %v545_v62 = vpop.permute.xlu1 %544  ;;  %v3479_v37 = vpop.permute.xlu0 %3478  ;;  %v695_v11 = vrot.slane %v525_v56, 4  ;;  %v693_v1 = vrot.slane %v527_v4, 4  ;;  %v694_v19 = vrot.slane %v526_v60, 4  ;;  %v798_v25 = vsel %vm791_vm7, %v790_v0, %v696_v28 }
  0xe5   : > { %v553_v63 = vsel %vm546_vm5, %v545_v62, %v3430_v36  ;;  %v3481_v6 = vunpack.i.h.bf16 %v3479_v37  ;;  %v3480_v12 = vunpack.i.l.bf16 %v3479_v37  ;;  %3049 = vmatmul.mubr.msk.bf16.vlgmr.msra.gmra.mrb[0].mxu1 %vm836_vm15, %v4427_v58 }
  0xe6   : > { %936 = vmatprep.mubr.bf16.mxu1 %v5710_v20  ;;  %v717_v8 = vrot.slane %v553_v63, 3  ;;  %v797_v30 = vsel %vm791_vm7, %v789_v44, %v695_v11 }
  0xe7   : > { %v547_v21 = vsel %vm546_vm5, %v3481_v6, %v545_v62  ;;  %v548_v24 = vsel %vm546_vm5, %v3480_v12, %v3481_v6  ;;  %v549_v36 = vsel %vm546_vm5, %v3431_v32, %v3480_v12  ;;  %v795_v32 = vsel %vm791_vm7, %v787_v14, %v693_v1 }
  0xe8   : > { %v567_v9 = vpop.permute.xlu1 %566  ;;  %v3484_v13 = vpop.permute.xlu0 %3483  ;;  %v714_v18 = vrot.slane %v549_v36, 3  ;;  %v716_v27 = vrot.slane %v547_v21, 3  ;;  %v715_v38 = vrot.slane %v548_v24, 3  ;;  %v806_v16 = vsel %vm799_vm9, %v798_v25, %v717_v8 }
  0xe9   : > { %v575_v52 = vsel %vm568_vm6, %v567_v9, %v3440_v49  ;;  %v3486_v35 = vunpack.i.h.bf16 %v3484_v13  ;;  %v3485_v40 = vunpack.i.l.bf16 %v3484_v13  ;;  %v796_v49 = vsel %vm791_vm7, %v788_v15, %v694_v19 }
  0xea   : > { %v738_v41 = vrot.slane %v575_v52, 2  ;;  %v803_v5 = vsel %vm799_vm9, %v795_v32, %v714_v18  ;;  %v805_v53 = vsel %vm799_vm9, %v797_v30, %v716_v27  ;;  %v804_v33 = vsel %vm799_vm9, %v796_v49, %v715_v38 }
  0xeb   : > { %v569_v43 = vsel %vm568_vm6, %v3486_v35, %v567_v9  ;;  %v570_v10 = vsel %vm568_vm6, %v3485_v40, %v3486_v35  ;;  %v571_v45 = vsel %vm568_vm6, %v3441_v48, %v3485_v40  ;;  %vm1340_vm9 = vcmask 293888  }
  0xec   : > { %v737_v42 = vrot.slane %v569_v43, 2  ;;  %v735_v55 = vrot.slane %v571_v45, 2  ;;  %v589_v31 = vpop.permute.xlu1 %588  ;;  %v3489_v46 = vpop.permute.xlu0 %3488  ;;  %v736_v51 = vrot.slane %v570_v10, 2  ;;  %v814_v34 = vsel %vm807_vm12, %v806_v16, %v738_v41 }
  0xed   : > { %v597_v61 = vsel %vm590_vm10, %v589_v31, %v3450_v3  ;;  %v3491_v47 = vunpack.i.h.bf16 %v3489_v46  ;;  %v3490_v50 = vunpack.i.l.bf16 %v3489_v46 }
  0xee   : > { %v759_v48 = vrot.slane %v597_v61, 1  ;;  %v811_v3 = vsel %vm807_vm12, %v803_v5, %v735_v55  ;;  %v813_v37 = vsel %vm807_vm12, %v805_v53, %v737_v42  ;;  %v812_v0 = vsel %vm807_vm12, %v804_v33, %v736_v51 }
  0xef   : > { %v592_v54 = vsel %vm590_vm10, %v3490_v50, %v3491_v47  ;;  %v593_v56 = vsel %vm590_vm10, %v3451_v2, %v3490_v50  ;;  %v591_v4 = vsel %vm590_vm10, %v3491_v47, %v589_v31 }
  0xf0   : > { %v756_v17 = vrot.slane %v593_v56, 1  ;;  %v757_v59 = vrot.slane %v592_v54, 1  ;;  %v3499_v28 = vpop.permute.xlu1 %3498  ;;  %v3494_v60 = vpop.permute.xlu0 %3493  ;;  %v758_v62 = vrot.slane %v591_v4, 1  ;;  %v822_v23 = vsel %vm815_vm13, %v814_v34, %v759_v48 }
  0xf1   : > { %v3501_v39 = vunpack.i.h.bf16 %v3499_v28  ;;  %v3500_v63 = vunpack.i.l.bf16 %v3499_v28  ;;  %v3496_v6 = vunpack.i.h.bf16 %v3494_v60  ;;  %v3495_v12 = vunpack.i.l.bf16 %v3494_v60 }
  0xf2   : > { %v819_v2 = vsel %vm815_vm13, %v811_v3, %v756_v17  ;;  %v821_v14 = vsel %vm815_vm13, %v813_v37, %v758_v62  ;;  %v820_v21 = vsel %vm815_vm13, %v812_v0, %v757_v59 }
  0xf3   : > { %v616_v11 = vsel %vm612_vm14, %v3466_v29, %v3495_v12  ;;  %v615_v1 = vsel %vm612_vm14, %v3495_v12, %v3496_v6  ;;  %v613_v19 = vsel %vm612_vm14, %v3500_v63, %v3501_v39  ;;  %v619_v24 = vsel %vm612_vm14, %v3501_v39, %v4376_v22 }
  0xf4   : > { %v825_v36 = vpack.c.bf16 %v616_v11, %v4380_v57  ;;  %v826_v15 = vpack.c.bf16 %v615_v1, %v819_v2  ;;  %v828_v44 = vpack.c.bf16 %v613_v19, %v821_v14  ;;  %v614_v29 = vsel %vm612_vm14, %v3496_v6, %v3500_v63  ;;  %v398_v63 = vld [vmem:[%s5702_s7 + $0x8] sm:$0xff] }
  0xf5   : > { %v827_v13 = vpack.c.bf16 %v614_v29, %v820_v21  ;;  %v829_v18 = vpack.c.bf16 %v619_v24, %v822_v23  ;;  %v5712_v57 = vmov 0.0  }
  0xf6   : > { %v852_v25 = vand.u32 %v4272_v7, %v826_v15  ;;  %v858_v8 = vand.u32 %v4272_v7, %v828_v44  ;;  %v849_v9 = vand.u32 %v4272_v7, %v825_v36 }
  0xf7   : > { %v855_v22 = vand.u32 %v4272_v7, %v827_v13  ;;  %v861_v52 = vand.u32 %v4272_v7, %v829_v18 }
  0xf8   : > { %904 = vmatprep.subr.bf16.mxu1 %v852_v25  ;;  %945 = vmatprep.subr.bf16.mxu0 %v858_v8 }
  0xf9   : > { %905 = vmatpush1.bf16.msra.mxu1 %v849_v9  ;;  %946 = vmatpush1.bf16.msra.mxu0 %v855_v22 }
  0xfa   : > { %3231 = vmatprep.subr.bf16.mxu1 %v5712_v57 }
  0xfc   : > { %3050 = vmatmul.mubr.msk.bf16.vlgmr.msra.gmra.mrb[4].mxu1 %vm836_vm15, %v4427_v58  ;;  %3051 = vmatmul.mubr.msk.bf16.vlgmr.msra.gmra.mrb[0].mxu0 %vm836_vm15, %v4427_v58 }
  0xfd   : > { %3232 = vmatpush3.bf16.msra.mxu1 %v861_v52  ;;  %3233 = vmatprep.mubr.msk.bf16.mxu1 %vm3986_vm2, %v5712_v57 }
  0xfe   : > { %1397 = vmatprep.mubr.bf16.mxu0 %v5710_v20 }
 0x101   : > { %v834_v27 = vpop.permute.xlu0 %833 }
 0x104   : > { %3234 = vmatmul.mubr.msk.bf16.vlgmr.msra.gmra.mrb[8].mxu1 %vm836_vm15, %v4427_v58 }
 0x105   : > { %1438 = vmatprep.mubr.bf16.mxu1 %v5710_v20 }
 0x1b8   : > { %v897_v35 = vpop.f32.mrb[0].mxu1 }
 0x1b9   : > { %v899_v7 = vpop.f32.mrb[1].mxu1  ;;  %v898_v56 = vadd.f32 %v897_v35, %v834_v27 }
 0x1ba   : > { %v901_v40 = vpop.f32.mrb[2].mxu1  ;;  %v900_v46 = vadd.f32 %v899_v7, %v834_v27 }
 0x1bb   : > { %v902_v32 = vpop.f32.mrb[3].mxu1  ;;  %v4548_v4 = vmax.f32 %v898_v56, 0.0 }
 0x1bc   : > { %v4533_v48 = vmax.f32 %v900_v46, 0.0 }
 0x1be   : > { %v3563_v59 = vpack.i.bf16 %v4533_v48, %v4548_v4 }
 0x1cf   : > { %v938_v38 = vpop.f32.mrb[4].mxu1  ;;  %v979_v30 = vpop.f32.mrb[0].mxu0 }
 0x1d0   : > { %v940_v43 = vpop.f32.mrb[5].mxu1  ;;  %v980_v10 = vadd.f32 %v979_v30, %v834_v27  ;;  %v981_v45 = vpop.f32.mrb[1].mxu0  ;;  %v939_v61 = vadd.f32 %v938_v38, %v834_v27 }
 0x1d1   : > { %v942_v49 = vpop.f32.mrb[6].mxu1  ;;  %v982_v16 = vadd.f32 %v981_v45, %v834_v27  ;;  %v983_v41 = vpop.f32.mrb[2].mxu0  ;;  %v941_v3 = vadd.f32 %v940_v43, %v834_v27 }
 0x1d2   : > { %v943_v42 = vpop.f32.mrb[7].mxu1  ;;  %v4522_v55 = vmax.f32 %v980_v10, 0.0  ;;  %v984_v31 = vpop.f32.mrb[3].mxu0  ;;  %v4535_v53 = vmax.f32 %v939_v61, 0.0 }
 0x1d3   : > { %v4524_v58 = vmax.f32 %v982_v16, 0.0  ;;  %v4550_v17 = vmax.f32 %v941_v3, 0.0 }
 0x1d4   : > { %1125 = vrot.lane.b32.xlu0 %v4522_v55, %s3979_s22  ;;  %v3518_v54 = vpack.i.bf16 %v4535_v53, %v4533_v48 }
 0x1d5   : > { %v3503_v47 = vpack.i.bf16 %v4524_v58, %v4522_v55  ;;  %v3553_v28 = vpack.i.bf16 %v4550_v17, %v4548_v4  ;;  %v3593_v62 = vpack.i.bf16 %v4550_v17, %v4535_v53 }
 0x1d7   : > { %v1020_v50 = vpop.f32.mrb[8].mxu1  ;;  %3504 = vrot.lane.b32.xlu1 %v3503_v47, %s3976_s30 }
 0x1d8   : > { %v3235_v5 = vpop.f32.mrb[9].mxu1  ;;  %1167 = vrot.lane.b32.xlu0 %v4522_v55, %s3981_s26  ;;  %v1021_v60 = vadd.f32 %v1020_v50, %v834_v27 }
 0x1d9   : > { %v1023_v51 = vpop.f32.mrb[10].mxu1 }
 0x1da   : > { %v3236_v33 = vpop.f32.mrb[11].mxu1  ;;  %v4569_v37 = vmax.f32 %v1021_v60, 0.0 }
 0x1db   : > { %3509 = vrot.lane.b32.xlu1 %v3503_v47, %s3977_s14 }
 0x1dc   : > { %1104 = vrot.lane.b32.xlu0 %v4522_v55, %s3978_s15  ;;  %v3603_v39 = vpack.i.bf16 %v4569_v37, %v4524_v58 }
 0x1df   : > { %3519 = vrot.lane.b32.xlu1 %v3518_v54, %s3976_s30 }
 0x1e0   : > { %3514 = vrot.lane.b32.xlu0 %v3503_v47, %s3975_s25 }
 0x1e3   : > { %3524 = vrot.lane.b32.xlu1 %v3518_v54, %s3977_s14 }
 0x1e4   : > { %3529 = vrot.lane.b32.xlu0 %v3518_v54, %s3975_s25 }
 0x1e7   : > { %3534 = vrot.lane.b32.xlu1 %v3518_v54, %s3979_s22 }
 0x1e8   : > { %3539 = vrot.lane.b32.xlu0 %v3518_v54, %s3981_s26 }
 0x1eb   : > { %3544 = vrot.lane.b32.xlu1 %v3518_v54, %s3978_s15 }
 0x1ec   : > { %3549 = vrot.lane.b32.xlu0 %v3518_v54, %s3980_s24 }
 0x1ef   : > { %3564 = vrot.lane.b32.xlu1 %v3563_v59, %s3982_s13 }
 0x1f0   : > { %3554 = vrot.lane.b32.xlu0 %v3553_v28, %s3976_s30 }
 0x1f3   : > { %3569 = vrot.lane.b32.xlu1 %v3553_v28, %s3975_s25 }
 0x1f4   : > { %3559 = vrot.lane.b32.xlu0 %v3553_v28, %s3977_s14 }
 0x1f7   : > { %3574 = vrot.lane.b32.xlu1 %v3553_v28, %s3979_s22 }
 0x1f8   : > { %1146 = vrot.lane.b32.xlu0 %v4522_v55, %s3980_s24 }
 0x1fb   : > { %3579 = vrot.lane.b32.xlu1 %v3553_v28, %s3981_s26 }
 0x1fc   : > { %3594 = vrot.lane.b32.xlu0 %v3593_v62, %s3982_s13 }
 0x1ff   : > { %3584 = vrot.lane.b32.xlu1 %v3553_v28, %s3978_s15 }
 0x200   : > { %1045 = vrot.lane.b32.xlu0 %v4569_v37, %s3976_s30 }
 0x203   : > { %3589 = vrot.lane.b32.xlu1 %v3553_v28, %s3980_s24 }
 0x204   : > { %1066 = vrot.lane.b32.xlu0 %v4569_v37, %s3975_s25 }
 0x207   : > { %1188 = vrot.lane.b32.xlu1 %v4522_v55, %s3982_s13 }
 0x208   : > { %3604 = vrot.lane.b32.xlu0 %v3603_v39, %s3981_s26 }
 0x20b   : > { %1087 = vrot.lane.b32.xlu1 %v4569_v37, %s3977_s14 }
 0x20c   : > { %3614 = vrot.lane.b32.xlu0 %v3603_v39, %s3980_s24 }
 0x20f   : > { %3599 = vrot.lane.b32.xlu1 %v3603_v39, %s3979_s22 }
 0x210   : > { %1337 = vperm.xlu0 %3502, %v398_v63  }
 0x213   : > { %3609 = vrot.lane.b32.xlu1 %v3603_v39, %s3978_s15 }
 0x217   : > { %3619 = vrot.lane.b32.xlu1 %v3603_v39, %s3982_s13 }
 0x246   : > { %v4591_v6 = vpop.permute.xlu0 %1125 }
 0x249   : > { %v4593_v12 = vpop.permute.xlu1 %3504 }
 0x24a   : > { %v4595_v34 = vpop.permute.xlu0 %1167  ;;  %v3507_v10 = vunpack.i.h.bf16 %v4593_v12  ;;  %v3506_v45 = vunpack.i.l.bf16 %v4593_v12 }
 0x24c   : > { %v4658_v51 = vsel %vm458_vm0, %v3506_v45, %v3507_v10 }
 0x24d   : > { %v4597_v2 = vpop.permute.xlu1 %3509 }
 0x24e   : > { %v4599_v14 = vpop.permute.xlu0 %1104  ;;  %v3511_v33 = vunpack.i.l.bf16 %v4597_v2 }
 0x251   : > { %v3520_v0 = vpop.permute.xlu1 %3519 }
 0x252   : > { %v3522_v11 = vunpack.i.h.bf16 %v3520_v0  ;;  %v3521_v1 = vunpack.i.l.bf16 %v3520_v0  ;;  %v4601_v19 = vpop.permute.xlu0 %3514 }
 0x253   : > { %v3516_v54 = vunpack.i.l.bf16 %v4601_v19 }
 0x254   : > { %v1051_v21 = vsel %vm458_vm0, %v3521_v1, %v3522_v11 }
 0x255   : > { %v3525_v24 = vpop.permute.xlu1 %3524  ;;  %v1209_v23 = vrot.slane %v1051_v21, 4 }
 0x256   : > { %v3527_v36 = vunpack.i.h.bf16 %v3525_v24  ;;  %v3526_v15 = vunpack.i.l.bf16 %v3525_v24  ;;  %v4605_v44 = vpop.permute.xlu0 %3529 }
 0x257   : > { %v3532_v29 = vunpack.i.h.bf16 %v4605_v44  ;;  %v3531_v25 = vunpack.i.l.bf16 %v4605_v44  ;;  %v1286_v52 = vsel %vm791_vm7, %v4533_v48, %v1209_v23  ;;  %v3512_v48 = vunpack.i.h.bf16 %v4597_v2 }
 0x258   : > { %v1093_v8 = vsel %vm502_vm3, %v3526_v15, %v3527_v36 }
 0x259   : > { %v1230_v9 = vrot.slane %v1093_v8, 4  ;;  %v1072_v13 = vsel %vm480_vm1, %v3531_v25, %v3532_v29  ;;  %v4615_v18 = vpop.permute.xlu1 %3534 }
 0x25a   : > { %v4617_v22 = vpop.permute.xlu0 %3539  ;;  %v3537_v27 = vunpack.i.h.bf16 %v4615_v18  ;;  %v3536_v38 = vunpack.i.l.bf16 %v4615_v18 }
 0x25b   : > { %v1293_v35 = vsel %vm791_vm7, %v1072_v13, %v1230_v9  ;;  %v3542_v30 = vunpack.i.h.bf16 %v4617_v22  ;;  %v3541_v43 = vunpack.i.l.bf16 %v4617_v22 }
 0x25c   : > { %v1314_v7 = vpack.c.bf16 %v1293_v35, %v1286_v52  ;;  %v1135_v61 = vsel %vm546_vm5, %v3536_v38, %v3537_v27 }
 0x25d   : > { %v4622_v40 = vpop.permute.xlu1 %3544  ;;  %v1177_v47 = vsel %vm590_vm10, %v3541_v43, %v3542_v30  ;;  %v1251_v28 = vrot.slane %v1135_v61, 4 }
 0x25e   : > { %v4624_v32 = vpop.permute.xlu0 %3549  ;;  %1365 = vmatprep.subr.bf16.mxu0 %v1314_v7  ;;  %v3547_v49 = vunpack.i.h.bf16 %v4622_v40  ;;  %v3546_v16 = vunpack.i.l.bf16 %v4622_v40  ;;  %v1272_v60 = vrot.slane %v1177_v47, 4 }
 0x25f   : > { %v3552_v42 = vunpack.i.h.bf16 %v4624_v32  ;;  %v3551_v31 = vunpack.i.l.bf16 %v4624_v32 }
 0x260   : > { %v1114_v56 = vsel %vm524_vm4, %v3546_v16, %v3547_v49 }
 0x261   : > { %v4634_v41 = vpop.permute.xlu1 %3564  ;;  %v1156_v62 = vsel %vm568_vm6, %v3551_v31, %v3552_v42  ;;  %v1300_v13 = vsel %vm791_vm7, %v1114_v56, %v1251_v28 }
 0x262   : > { %v4638_v46 = vpop.permute.xlu0 %3554  ;;  %v3567_v23 = vunpack.i.h.bf16 %v4634_v41  ;;  %v3566_v47 = vunpack.i.l.bf16 %v4634_v41  ;;  %v1307_v56 = vsel %vm791_vm7, %v1156_v62, %v1272_v60 }
 0x263   : > { %v3557_v50 = vunpack.i.h.bf16 %v4638_v46  ;;  %v3556_v5 = vunpack.i.l.bf16 %v4638_v46 }
 0x264   : > { %v4744_v44 = vsel %vm612_vm14, %v3566_v47, %v3567_v23 }
 0x265   : > { %v1052_v3 = vsel %vm458_vm0, %v3556_v5, %v3521_v1  ;;  %v4673_v59 = vpop.permute.xlu1 %3569  ;;  %v1049_v39 = vsel %vm458_vm0, %v3557_v50, %v3506_v45  ;;  %v1050_v8 = vsel %vm458_vm0, %v3522_v11, %v3557_v50 }
 0x266   : > { %v4683_v63 = vpop.permute.xlu0 %3559  ;;  %v3572_v0 = vunpack.i.h.bf16 %v4673_v59  ;;  %v3571_v1 = vunpack.i.l.bf16 %v4673_v59  ;;  %v1208_v9 = vrot.slane %v1052_v3, 4  ;;  %v1211_v52 = vrot.slane %v1049_v39, 4 }
 0x267   : > { %v3562_v21 = vunpack.i.h.bf16 %v4683_v63  ;;  %v5714_v24 = vunpack.i.l.bf16 %v4683_v63  ;;  %v1210_v28 = vrot.slane %v1050_v8, 4 }
 0x268   : > { %v1288_v57 = vsel %vm791_vm7, %v4550_v17, %v1211_v52 }
 0x269   : > { %v1091_v35 = vsel %vm502_vm3, %v3562_v21, %v3511_v33  ;;  %v1092_v7 = vsel %vm502_vm3, %v3527_v36, %v3562_v21  ;;  %v1094_v45 = vsel %vm502_vm3, %v5714_v24, %v3526_v15  ;;  %v4701_v61 = vpop.permute.xlu1 %3574  ;;  %v1070_v36 = vsel %vm480_vm1, %v3572_v0, %v3516_v54 }
 0x26a   : > { %v1232_v11 = vrot.slane %v1091_v35, 4  ;;  %v1229_v50 = vrot.slane %v1094_v45, 4  ;;  %v4704_v3 = vpop.permute.xlu0 %1146  ;;  %v1073_v15 = vsel %vm480_vm1, %v3571_v1, %v3531_v25  ;;  %v1231_v39 = vrot.slane %v1092_v7, 4 }
 0x26b   : > { %v3577_v21 = vunpack.i.h.bf16 %v4701_v61  ;;  %v1285_v35 = vsel %vm791_vm7, %v4548_v4, %v1208_v9  ;;  %v3576_v62 = vunpack.i.l.bf16 %v4701_v61  ;;  %v1321_v24 = vpack.c.bf16 %v1307_v56, %v1300_v13 }
 0x26c   : > { %v1292_v45 = vsel %vm791_vm7, %v1073_v15, %v1229_v50  ;;  %v1295_v60 = vsel %vm791_vm7, %v1070_v36, %v1232_v11  ;;  %v1071_v25 = vsel %vm480_vm1, %v3532_v29, %v3572_v0  ;;  %v4735_v50 = vsel %vm502_vm3, %v3511_v33, %v3512_v48 }
 0x26d   : > { %v4721_v8 = vpop.permute.xlu1 %3579  ;;  %v1313_v20 = vpack.c.bf16 %v1292_v45, %v1285_v35  ;;  %v1316_v11 = vpack.c.bf16 %v1295_v60, %v1288_v57  ;;  %v1294_v17 = vsel %vm791_vm7, %v1071_v25, %v1231_v39  ;;  %v1212_v29 = vrot.slane %v4658_v51, 4 }
 0x26e   : > { %v3582_v4 = vunpack.i.h.bf16 %v4721_v8  ;;  %v3581_v9 = vunpack.i.l.bf16 %v4721_v8  ;;  %v3595_v7 = vpop.permute.xlu0 %3594  ;;  %v1133_v57 = vsel %vm546_vm5, %v3577_v21, %v4591_v6  ;;  %v1287_v33 = vsel %vm791_vm7, %v4535_v53, %v1210_v28 }
 0x26f   : > { %1366 = vmatpush1.bf16.msra.mxu0 %v1313_v20  ;;  %v1134_v20 = vsel %vm546_vm5, %v3537_v27, %v3577_v21  ;;  %1406 = vmatprep.subr.bf16.mxu1 %v1316_v11  ;;  %v1136_v0 = vsel %vm546_vm5, %v3576_v62, %v3536_v38  ;;  %v1315_v18 = vpack.c.bf16 %v1294_v17, %v1287_v33  ;;  %v3517_v36 = vunpack.i.h.bf16 %v4601_v19 }
 0x270   : > { %1367 = vmatprep.subr.bf16.mxu0 %v1321_v24  ;;  %v1175_v13 = vsel %vm590_vm10, %v3582_v4, %v4595_v34  ;;  %v1176_v27 = vsel %vm590_vm10, %v3542_v30, %v3582_v4  ;;  %v3596_v24 = vunpack.i.l.bf16 %v3595_v7  ;;  %v1178_v53 = vsel %vm590_vm10, %v3581_v9, %v3541_v43 }
 0x271   : > { %v4769_v52 = vpop.permute.xlu1 %3584  ;;  %v1252_v15 = vrot.slane %v1134_v20, 4  ;;  %v3597_v30 = vunpack.i.h.bf16 %v3595_v7  ;;  %v1327_v39 = vpack.c.bf16 %v4744_v44, %v4744_v44  ;;  %v1253_v21 = vrot.slane %v1133_v57, 4  ;;  %1407 = vmatpush1.bf16.msra.mxu1 %v1315_v18 }
 0x272   : > { %v3587_v38 = vunpack.i.h.bf16 %v4769_v52  ;;  %v3586_v56 = vunpack.i.l.bf16 %v4769_v52  ;;  %v1046_v28 = vpop.permute.xlu0 %1045  ;;  %v1250_v22 = vrot.slane %v1136_v0, 4  ;;  %v1273_v45 = vrot.slane %v1176_v27, 4 }
 0x273   : > { %v1047_v35 = vsel %vm458_vm0, %v3507_v10, %v1046_v28  ;;  %v1274_v60 = vrot.slane %v1175_v13, 4  ;;  %v1271_v25 = vrot.slane %v1178_v53, 4  ;;  %v1198_v11 = vsel %vm612_vm14, %v3567_v23, %v3596_v24 }
 0x274   : > { %v1115_v43 = vsel %vm524_vm4, %v3586_v56, %v3546_v16  ;;  %v1112_v4 = vsel %vm524_vm4, %v3587_v38, %v4599_v14  ;;  %v1113_v12 = vsel %vm524_vm4, %v3547_v49, %v3587_v38  ;;  %v1053_v44 = vsel %vm458_vm0, %v1046_v28, %v3556_v5 }
 0x275   : > { %v4795_v7 = vpop.permute.xlu1 %3589  ;;  %v1213_v57 = vrot.slane %v1047_v35, 4  ;;  %v1299_v20 = vsel %vm791_vm7, %v1115_v43, %v1250_v22  ;;  %v1197_v23 = vsel %vm612_vm14, %v3596_v24, %v3597_v30  ;;  %v1302_v5 = vsel %vm791_vm7, %v1112_v4, %v1253_v21 }
 0x276   : > { %v3592_v10 = vunpack.i.h.bf16 %v4795_v7  ;;  %v3591_v16 = vunpack.i.l.bf16 %v4795_v7  ;;  %v1067_v17 = vpop.permute.xlu0 %1066  ;;  %v1069_v38 = vsel %vm480_vm1, %v3516_v54, %v3517_v36  ;;  %v1328_v28 = vpack.c.bf16 %v1198_v11, %v1198_v11 }
 0x277   : > { %v1214_v22 = vrot.slane %v1053_v44, 4  ;;  %v1329_v43 = vpack.c.bf16 %v1197_v23, %v1197_v23  ;;  %v1289_v54 = vsel %vm791_vm7, %v4522_v55, %v1212_v29  ;;  %v1290_v4 = vsel %vm791_vm7, %v4524_v58, %v1213_v57 }
 0x278   : > { %v1155_v40 = vsel %vm568_vm6, %v3552_v42, %v3592_v10  ;;  %v1154_v49 = vsel %vm568_vm6, %v3592_v10, %v4704_v3  ;;  %v1157_v46 = vsel %vm568_vm6, %v3591_v16, %v3551_v31  ;;  %v1301_v42 = vsel %vm791_vm7, %v1113_v12, %v1252_v15 }
 0x279   : > { %v4828_v33 = vpop.permute.xlu1 %1188  ;;  %v1306_v0 = vsel %vm791_vm7, %v1157_v46, %v1271_v25  ;;  %v1309_v13 = vsel %vm791_vm7, %v1154_v49, %v1274_v60  ;;  %v1308_v27 = vsel %vm791_vm7, %v1155_v40, %v1273_v45  ;;  %v1233_v15 = vrot.slane %v4735_v50, 4 }
 0x27a   : > { %v1196_v32 = vsel %vm612_vm14, %v3597_v30, %v4828_v33  ;;  %v3605_v24 = vpop.permute.xlu0 %3604  ;;  %v1320_v53 = vpack.c.bf16 %v1306_v0, %v1299_v20  ;;  %v1323_v18 = vpack.c.bf16 %v1309_v13, %v1302_v5  ;;  %v1322_v31 = vpack.c.bf16 %v1308_v27, %v1301_v42 }
 0x27b   : > { %v1330_v21 = vpack.c.bf16 %v1196_v32, %v1196_v32  ;;  %v3607_v30 = vunpack.i.h.bf16 %v3605_v24  ;;  %v3606_v35 = vunpack.i.l.bf16 %v3605_v24  ;;  %v1345_v25 = vsel %vm775_vm8, %v1327_v39, 0 }
 0x27c   : > { %1368 = vmatpush1.bf16.msra.mxu0 %v1320_v53  ;;  %1408 = vmatprep.subr.bf16.mxu1 %v1323_v18  ;;  %v1296_v11 = vsel %vm791_vm7, %v1069_v38, %v1233_v15  ;;  %v5723_v51 = vunpack.i.l.bf16 %v4683_v63  ;;  %v1068_v39 = vsel %vm480_vm1, %v3517_v36, %v1067_v17  ;;  %v1351_v58 = vsel %vm775_vm8, %v1329_v43, 0  ;;  %v4872_v63 = vld [vmem:[%s5697_s2] sm:$0xf] }
 0x27d   : > { %v1088_v45 = vpop.permute.xlu1 %1087  ;;  %3053 = vmatprep.subr.msk.bf16.mxu0 %vm775_vm8, %v1328_v28  ;;  %1409 = vmatpush1.bf16.msra.mxu1 %v1322_v31  ;;  %v1074_v44 = vsel %vm480_vm1, %v1067_v17, %v3571_v1  ;;  %v1173_v19 = vsel %vm590_vm10, %v3606_v35, %v3607_v30  ;;  %v5724_v49 = vmov 0.0   ;;  %v1174_v1 = vsel %vm590_vm10, %v4595_v34, %v3606_v35 }
 0x27e   : > { %v1089_v50 = vsel %vm502_vm3, %v3512_v48, %v1088_v45  ;;  %v3615_v60 = vpop.permute.xlu0 %3614  ;;  %3055 = vmatprep.subr.msk.bf16.mxu1 %vm775_vm8, %v1330_v21  ;;  %v1095_v55 = vsel %vm502_vm3, %v1088_v45, %v5723_v51  ;;  %v1291_v48 = vsel %vm791_vm7, %v4569_v37, %v1214_v22  ;;  %v1179_v37 = vsel %vm590_vm10, %v3607_v30, %v3581_v9 }
 0x27f   : > { %v1234_v29 = vrot.slane %v1089_v50, 4  ;;  %v3617_v2 = vunpack.i.h.bf16 %v3615_v60  ;;  %v3616_v12 = vunpack.i.l.bf16 %v3615_v60  ;;  %v1235_v10 = vrot.slane %v1095_v55, 4 }
 0x280   : > { %1370 = vmatpush1.bf16.msra.mxu0 %v1345_v25  ;;  %v1317_v9 = vpack.c.bf16 %v1296_v11, %v1289_v54  ;;  %v1277_v0 = vrot.slane %v1179_v37, 4  ;;  %v1276_v13 = vrot.slane %v1173_v19, 4  ;;  %v5725_v18 = vmov 0  }
 0x281   : > { %v3600_v36 = vpop.permute.xlu1 %3599  ;;  %1411 = vmatpush1.bf16.msra.mxu1 %v1351_v58  ;;  %v1297_v57 = vsel %vm791_vm7, %v1068_v39, %v1234_v29  ;;  %v1298_v20 = vsel %vm791_vm7, %v1074_v44, %v1235_v10  ;;  %v1152_v8 = vsel %vm568_vm6, %v3616_v12, %v3617_v2  ;;  %v1158_v42 = vsel %vm568_vm6, %v3617_v2, %v3591_v16 }
 0x282   : > { %v3602_v23 = vunpack.i.h.bf16 %v3600_v36  ;;  %v3601_v40 = vunpack.i.l.bf16 %v3600_v36  ;;  %v1318_v59 = vpack.c.bf16 %v1297_v57, %v1290_v4  ;;  %3237 = vmatprep.subr.bf16.mxu1 %v5724_v49  ;;  %v1319_v17 = vpack.c.bf16 %v1298_v20, %v1291_v48 }
 0x283   : > { %3054 = vmatmul.mubr.msk.bf16.vlgmr.msra.gmra.mrb[4].mxu0 %vm1340_vm9, %v4872_v63  ;;  %v1153_v61 = vsel %vm568_vm6, %v4704_v3, %v3616_v12  ;;  %v1311_v16 = vsel %vm791_vm7, %v1152_v8, %v1276_v13  ;;  %v1312_v28 = vsel %vm791_vm7, %v1158_v42, %v1277_v0 }
 0x284   : > { %v1131_v46 = vsel %vm546_vm5, %v3601_v40, %v3602_v23  ;;  %v1132_v5 = vsel %vm546_vm5, %v4591_v6, %v3601_v40  ;;  %v1137_v34 = vsel %vm546_vm5, %v3602_v23, %v3576_v62  ;;  %3056 = vmatmul.mubr.msk.bf16.vlgmr.msra.gmra.mrb[12].mxu1 %vm1340_vm9, %v4872_v63  ;;  %1447 = vmatprep.subr.bf16.mxu0 %v1318_v59  ;;  %v1275_v6 = vrot.slane %v1174_v1, 4 }
 0x285   : > { %v3610_v27 = vpop.permute.xlu1 %3609  ;;  %1448 = vmatpush1.bf16.msra.mxu0 %v1317_v9  ;;  %3238 = vmatpush3.bf16.msra.mxu1 %v1319_v17  ;;  %v1254_v24 = vrot.slane %v1132_v5, 4  ;;  %v1255_v7 = vrot.slane %v1131_v46, 4  ;;  %v1256_v53 = vrot.slane %v1137_v34, 4 }
 0x286   : > { %v3612_v62 = vunpack.i.h.bf16 %v3610_v27  ;;  %v3611_v32 = vunpack.i.l.bf16 %v3610_v27  ;;  %3239 = vmatprep.subr.bf16.mxu1 %v5724_v49  ;;  %3243 = vmatprep.mubr.msk.bf16.mxu1 %vm3986_vm2, %v5724_v49  ;;  %v1310_v30 = vsel %vm791_vm7, %v1153_v61, %v1275_v6 }
 0x287   : > { %1479 = vmatprep.mubr.bf16.mxu0 %v5725_v18 }
 0x288   : > { %v1110_v31 = vsel %vm524_vm4, %v3611_v32, %v3612_v62  ;;  %v1111_v3 = vsel %vm524_vm4, %v4599_v14, %v3611_v32  ;;  %v1116_v38 = vsel %vm524_vm4, %v3612_v62, %v3586_v56 }
 0x289   : > { %v3620_v21 = vpop.permute.xlu1 %3619  ;;  %v1304_v15 = vsel %vm791_vm7, %v1110_v31, %v1255_v7  ;;  %v1305_v22 = vsel %vm791_vm7, %v1116_v38, %v1256_v53  ;;  %v1303_v43 = vsel %vm791_vm7, %v1111_v3, %v1254_v24  ;;  %v400_v53 = vld [vmem:[%s5702_s7 + $0x18] sm:$0xff] }
 0x28a   : > { %v3622_v35 = vunpack.i.h.bf16 %v3620_v21  ;;  %v3621_v45 = vunpack.i.l.bf16 %v3620_v21  ;;  %v1325_v54 = vpack.c.bf16 %v1311_v16, %v1304_v15  ;;  %v1326_v14 = vpack.c.bf16 %v1312_v28, %v1305_v22  ;;  %v399_v16 = vld [vmem:[%s5702_s7 + $0x10] sm:$0xff] }
 0x28b   : > { %v1324_v50 = vpack.c.bf16 %v1310_v30, %v1303_v43 }
 0x28c   : > { %v1194_v52 = vsel %vm612_vm14, %v3621_v45, %v3622_v35  ;;  %1449 = vmatprep.subr.bf16.mxu0 %v1325_v54  ;;  %3240 = vmatpush3.bf16.msra.mxu1 %v1326_v14  ;;  %v1200_v56 = vsel %vm612_vm14, %v3622_v35, %v3566_v47  ;;  %v1195_v60 = vsel %vm612_vm14, %v4828_v33, %v3621_v45 }
 0x28d   : > { %v1332_v25 = vpack.c.bf16 %v1194_v52, %v1194_v52  ;;  %1450 = vmatpush1.bf16.msra.mxu0 %v1324_v50  ;;  %3241 = vmatprep.subr.bf16.mxu1 %v5724_v49  ;;  %v1333_v4 = vpack.c.bf16 %v1200_v56, %v1200_v56  ;;  %v1331_v11 = vpack.c.bf16 %v1195_v60, %v1195_v60 }
 0x28f   : > { %3057 = vmatprep.subr.msk.bf16.mxu0 %vm775_vm8, %v1332_v25  ;;  %v1363_v51 = vsel %vm775_vm8, %v1333_v4, 0  ;;  %v1357_v55 = vsel %vm775_vm8, %v1331_v11, 0  ;;  %v1338_v41 = vpop.permute.xlu0 %1337 }
 0x290   : > { %3242 = vmatpush3.bf16.msra.mxu1 %v1363_v51 }
 0x291   : > { %1452 = vmatpush1.bf16.msra.mxu0 %v1357_v55 }
 0x293   : > { %3244 = vmatmul.mubr.msk.bf16.vlgmr.msra.gmra.mrb[16].mxu1 %vm1340_vm9, %v4872_v63 }
 0x294   : > { %3058 = vmatmul.mubr.msk.bf16.vlgmr.msra.gmra.mrb[8].mxu0 %vm1340_vm9, %v4872_v63  ;;  %1855 = vmatprep.mubr.bf16.mxu1 %v5725_v18 }
 0x295   : > { %1812 = vmatprep.mubr.bf16.mxu0 %v5725_v18 }
 0x356   : > { %v1399_v47 = vpop.f32.mrb[4].mxu0 }
 0x357   : > { %v1401_v33 = vpop.f32.mrb[5].mxu0  ;;  %v1440_v29 = vpop.f32.mrb[12].mxu1  ;;  %v1400_v36 = vadd.f32 %v1399_v47, %v1338_v41 }
 0x358   : > { %v1402_v2 = vadd.f32 %v1401_v33, %v1338_v41  ;;  %v1441_v12 = vadd.f32 %v1440_v29, %v1338_v41  ;;  %v1403_v48 = vpop.f32.mrb[6].mxu0  ;;  %v1442_v39 = vpop.f32.mrb[13].mxu1 }
 0x359   : > { %v1404_v10 = vpop.f32.mrb[7].mxu0  ;;  %v1444_v58 = vpop.f32.mrb[14].mxu1  ;;  %v4960_v57 = vmax.f32 %v1400_v36, 0.0  ;;  %v1443_v20 = vadd.f32 %v1442_v39, %v1338_v41 }
 0x35a   : > { %v4950_v44 = vmax.f32 %v1402_v2, 0.0  ;;  %v4952_v37 = vmax.f32 %v1441_v12, 0.0  ;;  %v1445_v19 = vpop.f32.mrb[15].mxu1 }
 0x35b   : > { %v4964_v1 = vmax.f32 %v1443_v20, 0.0 }
 0x35c   : > { %v3633_v63 = vpack.i.bf16 %v4952_v37, %v4950_v44  ;;  %v3658_v9 = vpack.i.bf16 %v4950_v44, %v4960_v57 }
 0x35d   : > { %v3663_v0 = vpack.i.bf16 %v4964_v1, %v4960_v57 }
 0x35e   : > { %3634 = vrot.lane.b32.xlu0 %v3633_v63, %s3977_s14  ;;  %3624 = vrot.lane.b32.xlu1 %v3633_v63, %s3976_s30 }
 0x362   : > { %3644 = vrot.lane.b32.xlu0 %v3633_v63, %s3979_s22  ;;  %3629 = vrot.lane.b32.xlu1 %v3633_v63, %s3975_s25 }
 0x366   : > { %v1522_v23 = vpop.f32.mrb[16].mxu1  ;;  %3654 = vrot.lane.b32.xlu0 %v3633_v63, %s3981_s26  ;;  %3639 = vrot.lane.b32.xlu1 %v3633_v63, %s3978_s15 }
 0x367   : > { %v1481_v40 = vpop.f32.mrb[8].mxu0  ;;  %v3245_v59 = vpop.f32.mrb[17].mxu1  ;;  %v1523_v62 = vadd.f32 %v1522_v23, %v1338_v41 }
 0x368   : > { %v1483_v8 = vpop.f32.mrb[9].mxu0  ;;  %v1525_v17 = vpop.f32.mrb[18].mxu1  ;;  %v1482_v13 = vadd.f32 %v1481_v40, %v1338_v41 }
 0x369   : > { %v1485_v46 = vpop.f32.mrb[10].mxu0  ;;  %v3246_v5 = vpop.f32.mrb[19].mxu1  ;;  %v1484_v27 = vadd.f32 %v1483_v8, %v1338_v41  ;;  %v4994_v24 = vmax.f32 %v1523_v62, 0.0 }
 0x36a   : > { %3649 = vrot.lane.b32.xlu1 %v3633_v63, %s3980_s24  ;;  %3659 = vrot.lane.b32.xlu0 %v3658_v9, %s3982_s13  ;;  %v1486_v34 = vpop.f32.mrb[11].mxu0  ;;  %v4979_v42 = vmax.f32 %v1482_v13, 0.0 }
 0x36b   : > { %v4983_v6 = vmax.f32 %v1484_v27, 0.0 }
 0x36c   : > { %v3698_v61 = vpack.i.bf16 %v4979_v42, %v4964_v1 }
 0x36d   : > { %v3703_v32 = vpack.i.bf16 %v4983_v6, %v4979_v42  ;;  %v3733_v7 = vpack.i.bf16 %v4994_v24, %v4983_v6 }
 0x36e   : > { %1686 = vrot.lane.b32.xlu1 %v4952_v37, %s3982_s13  ;;  %3664 = vrot.lane.b32.xlu0 %v3663_v0, %s3976_s30 }
 0x372   : > { %3669 = vrot.lane.b32.xlu1 %v3663_v0, %s3975_s25  ;;  %3674 = vrot.lane.b32.xlu0 %v3663_v0, %s3977_s14 }
 0x376   : > { %3679 = vrot.lane.b32.xlu1 %v3663_v0, %s3978_s15  ;;  %3684 = vrot.lane.b32.xlu0 %v3663_v0, %s3979_s22 }
 0x37a   : > { %3689 = vrot.lane.b32.xlu1 %v3663_v0, %s3980_s24  ;;  %3694 = vrot.lane.b32.xlu0 %v3663_v0, %s3981_s26 }
 0x37e   : > { %3699 = vrot.lane.b32.xlu1 %v3698_v61, %s3982_s13  ;;  %1669 = vrot.lane.b32.xlu0 %v4979_v42, %s3981_s26 }
 0x382   : > { %3704 = vrot.lane.b32.xlu1 %v3703_v32, %s3976_s30  ;;  %3709 = vrot.lane.b32.xlu0 %v3703_v32, %s3975_s25 }
 0x386   : > { %3714 = vrot.lane.b32.xlu1 %v3703_v32, %s3977_s14  ;;  %1547 = vrot.lane.b32.xlu0 %v4994_v24, %s3976_s30 }
 0x38a   : > { %3719 = vrot.lane.b32.xlu1 %v3703_v32, %s3978_s15  ;;  %3724 = vrot.lane.b32.xlu0 %v3703_v32, %s3979_s22 }
 0x38e   : > { %1568 = vrot.lane.b32.xlu1 %v4994_v24, %s3975_s25  ;;  %1589 = vrot.lane.b32.xlu0 %v4994_v24, %s3977_s14 }
 0x392   : > { %3729 = vrot.lane.b32.xlu1 %v3703_v32, %s3980_s24  ;;  %1631 = vrot.lane.b32.xlu0 %v4994_v24, %s3979_s22  ;;  %s3989_s22 = smov 116  }
 0x396   : > { %1610 = vrot.lane.b32.xlu1 %v4994_v24, %s3978_s15  ;;  %1652 = vrot.lane.b32.xlu0 %v4994_v24, %s3980_s24  ;;  %s3990_s15 = smov 105   ;;  %s3991_s24 = smov 104  }
 0x39a   : > { %3734 = vrot.lane.b32.xlu1 %v3733_v7, %s3981_s26  ;;  %3739 = vrot.lane.b32.xlu0 %v3733_v7, %s3982_s13  ;;  %s3992_s26 = smov 106   ;;  %s3129_s13 = sshll.u32 %s4075_s21, 4 }
 0x39b   : > { %s3993_s21 = smov [#allocation5]  }
 0x39e   : > { %1747 = vperm.xlu0 %3502, %v400_v53   ;;  %1742 = vperm.xlu1 %3743, %v399_v16  }
 0x3d0   : > { %v5022_v31 = vpop.permute.xlu0 %3634  ;;  %v5024_v3 = vpop.permute.xlu1 %3624 }
 0x3d1   : > { %v3627_v38 = vunpack.i.h.bf16 %v5024_v3  ;;  %v3626_v28 = vunpack.i.l.bf16 %v5024_v3  ;;  %v3637_v52 = vunpack.i.h.bf16 %v5022_v31  ;;  %v3636_v56 = vunpack.i.l.bf16 %v5022_v31 }
 0x3d3   : > { %v1553_v21 = vsel %vm458_vm0, %v3626_v28, %v3627_v38  ;;  %v1595_v48 = vsel %vm502_vm3, %v3636_v56, %v3637_v52 }
 0x3d4   : > { %v5032_v15 = vpop.permute.xlu0 %3644  ;;  %v5034_v22 = vpop.permute.xlu1 %3629  ;;  %v1704_v43 = vpack.c.bf16 %v1553_v21, %v4950_v44 }
 0x3d5   : > { %v3632_v14 = vunpack.i.h.bf16 %v5034_v22  ;;  %v3631_v50 = vunpack.i.l.bf16 %v5034_v22  ;;  %v3647_v47 = vunpack.i.h.bf16 %v5032_v15  ;;  %v3646_v33 = vunpack.i.l.bf16 %v5032_v15 }
 0x3d6   : > { %1780 = vmatprep.subr.bf16.mxu0 %v1704_v43 }
 0x3d7   : > { %v1574_v55 = vsel %vm480_vm1, %v3631_v50, %v3632_v14  ;;  %v1637_v9 = vsel %vm546_vm5, %v3646_v33, %v3647_v47 }
 0x3d8   : > { %v5037_v30 = vpop.permute.xlu0 %3654  ;;  %v5039_v35 = vpop.permute.xlu1 %3639  ;;  %v1711_v58 = vpack.c.bf16 %v1595_v48, %v1574_v55 }
 0x3d9   : > { %v3642_v11 = vunpack.i.h.bf16 %v5039_v35  ;;  %v3641_v51 = vunpack.i.l.bf16 %v5039_v35  ;;  %v3657_v20 = vunpack.i.h.bf16 %v5037_v30  ;;  %v3656_v23 = vunpack.i.l.bf16 %v5037_v30 }
 0x3db   : > { %v1616_v63 = vsel %vm524_vm4, %v3641_v51, %v3642_v11  ;;  %v1679_v53 = vsel %vm590_vm10, %v3656_v23, %v3657_v20 }
 0x3dc   : > { %v5041_v45 = vpop.permute.xlu1 %3649  ;;  %v5043_v54 = vpop.permute.xlu0 %3659  ;;  %v1718_v5 = vpack.c.bf16 %v1637_v9, %v1616_v63  ;;  %v5153_v9 = vld [vmem:[%s5698_s3] sm:$0xff]  }
 0x3dd   : > { %v3652_v44 = vunpack.i.h.bf16 %v5041_v45  ;;  %v3651_v19 = vunpack.i.l.bf16 %v5041_v45  ;;  %v3662_v34 = vunpack.i.h.bf16 %v5043_v54  ;;  %v3661_v0 = vunpack.i.l.bf16 %v5043_v54 }
 0x3df   : > { %v1658_v13 = vsel %vm568_vm6, %v3651_v19, %v3652_v44 }
 0x3e0   : > { %v5049_v60 = vpop.permute.xlu1 %1686  ;;  %v5051_v25 = vpop.permute.xlu0 %3664  ;;  %v1725_v21 = vpack.c.bf16 %v1679_v53, %v1658_v13 }
 0x3e1   : > { %v3666_v4 = vunpack.i.l.bf16 %v5051_v25  ;;  %v1700_v43 = vsel %vm612_vm14, %v3662_v34, %v5049_v60 }
 0x3e3   : > { %v1554_v41 = vsel %vm458_vm0, %v3666_v4, %v3626_v28 }
 0x3e4   : > { %v1703_v29 = vpack.c.bf16 %v1554_v41, %v4960_v57  ;;  %v5067_v2 = vpop.permute.xlu1 %3669  ;;  %v5069_v12 = vpop.permute.xlu0 %3674 }
 0x3e5   : > { %v3671_v39 = vunpack.i.l.bf16 %v5067_v2  ;;  %v3676_v10 = vunpack.i.l.bf16 %v5069_v12 }
 0x3e6   : > { %1781 = vmatpush1.bf16.msra.mxu0 %v1703_v29  ;;  %v1732_v29 = vpack.c.bf16 %v1700_v43, %v1700_v43 }
 0x3e7   : > { %v1575_v36 = vsel %vm480_vm1, %v3671_v39, %v3631_v50  ;;  %v1596_v57 = vsel %vm502_vm3, %v3676_v10, %v3636_v56  ;;  %1782 = vmatprep.subr.bf16.mxu0 %v1711_v58  ;;  %v1701_v50 = vsel %vm612_vm14, %v3661_v0, %v3662_v34  ;;  %v3667_v58 = vunpack.i.h.bf16 %v5051_v25 }
 0x3e8   : > { %v1710_v40 = vpack.c.bf16 %v1596_v57, %v1575_v36  ;;  %v5093_v59 = vpop.permute.xlu1 %3679  ;;  %v5095_v8 = vpop.permute.xlu0 %3684  ;;  %v1731_v48 = vpack.c.bf16 %v1701_v50, %v1701_v50  ;;  %v3672_v36 = vunpack.i.h.bf16 %v5067_v2  ;;  %v3677_v34 = vunpack.i.h.bf16 %v5069_v12 }
 0x3e9   : > { %v3681_v17 = vunpack.i.l.bf16 %v5093_v59  ;;  %v3686_v46 = vunpack.i.l.bf16 %v5095_v8  ;;  %v3687_v22 = vunpack.i.h.bf16 %v5095_v8 }
 0x3ea   : > { %1783 = vmatpush1.bf16.msra.mxu0 %v1710_v40 }
 0x3eb   : > { %v1617_v27 = vsel %vm524_vm4, %v3681_v17, %v3641_v51  ;;  %v1638_v61 = vsel %vm546_vm5, %v3686_v46, %v3646_v33  ;;  %1784 = vmatprep.subr.bf16.mxu0 %v1718_v5  ;;  %v1552_v5 = vsel %vm458_vm0, %v3627_v38, %v3667_v58  ;;  %v1573_v38 = vsel %vm480_vm1, %v3632_v14, %v3672_v36 }
 0x3ec   : > { %v1717_v62 = vpack.c.bf16 %v1638_v61, %v1617_v27  ;;  %v5117_v32 = vpop.permute.xlu1 %3689  ;;  %v5119_v7 = vpop.permute.xlu0 %3694  ;;  %v1705_v3 = vpack.c.bf16 %v1552_v5, %v4952_v37  ;;  %v3682_v37 = vunpack.i.h.bf16 %v5093_v59 }
 0x3ed   : > { %v3691_v16 = vunpack.i.l.bf16 %v5117_v32  ;;  %v3696_v28 = vunpack.i.l.bf16 %v5119_v7 }
 0x3ee   : > { %1785 = vmatpush1.bf16.msra.mxu0 %v1717_v62 }
 0x3ef   : > { %v1659_v56 = vsel %vm568_vm6, %v3691_v16, %v3651_v19  ;;  %v1680_v51 = vsel %vm590_vm10, %v3696_v28, %v3656_v23  ;;  %1786 = vmatprep.subr.bf16.mxu0 %v1725_v21  ;;  %v1760_v23 = vsel %vm791_vm7, %v1731_v48, 0 }
 0x3f0   : > { %v1724_v55 = vpack.c.bf16 %v1680_v51, %v1659_v56  ;;  %v5142_v41 = vpop.permute.xlu1 %3699  ;;  %v5144_v33 = vpop.permute.xlu0 %1669 }
 0x3f2   : > { %1787 = vmatpush1.bf16.msra.mxu0 %v1724_v55 }
 0x3f3   : > { %3061 = vmatprep.subr.msk.bf16.mxu0 %vm791_vm7, %v1732_v29 }
 0x3f4   : > { %v3705_v63 = vpop.permute.xlu1 %3704  ;;  %v3710_v19 = vpop.permute.xlu0 %3709 }
 0x3f5   : > { %v3707_v57 = vunpack.i.h.bf16 %v3705_v63  ;;  %v3706_v40 = vunpack.i.l.bf16 %v3705_v63  ;;  %v3711_v13 = vunpack.i.l.bf16 %v3710_v19 }
 0x3f6   : > { %1789 = vmatpush1.bf16.msra.mxu0 %v1760_v23 }
 0x3f7   : > { %v1551_v27 = vsel %vm458_vm0, %v3667_v58, %v3706_v40  ;;  %v1550_v61 = vsel %vm458_vm0, %v3706_v40, %v3707_v57  ;;  %v1572_v51 = vsel %vm480_vm1, %v3672_v36, %v3711_v13  ;;  %v3712_v36 = vunpack.i.h.bf16 %v3710_v19 }
 0x3f8   : > { %v3715_v62 = vpop.permute.xlu1 %3714  ;;  %v5164_v53 = vpop.permute.xlu0 %1547  ;;  %v1706_v21 = vpack.c.bf16 %v1551_v27, %v4964_v1  ;;  %v1594_v1 = vsel %vm502_vm3, %v3637_v52, %v3677_v34  ;;  %v1707_v14 = vpack.c.bf16 %v1550_v61, %v4979_v42  ;;  %v1636_v42 = vsel %vm546_vm5, %v3647_v47, %v3687_v22 }
 0x3f9   : > { %v3716_v43 = vunpack.i.l.bf16 %v3715_v62  ;;  %v1549_v50 = vsel %vm458_vm0, %v3707_v57, %v5164_v53  ;;  %3062 = vmatmul.mubr.msk.bf16.vlgmr.msra.gmra.mrb[12].mxu0 %vm1755_vm11, %v5153_v9  ;;  %v3717_v55 = vunpack.i.h.bf16 %v3715_v62  ;;  %v1712_v58 = vpack.c.bf16 %v1594_v1, %v1573_v38 }
 0x3fa   : > { %v1708_v56 = vpack.c.bf16 %v1549_v50, %v4983_v6  ;;  %1823 = vmatprep.subr.bf16.mxu1 %v1706_v21  ;;  %1898 = vmatprep.mubr.bf16.mxu0 %v5725_v18  ;;  %v1615_v18 = vsel %vm524_vm4, %v3642_v11, %v3682_v37  ;;  %v3697_v27 = vunpack.i.h.bf16 %v5119_v7  ;;  %v1571_v61 = vsel %vm480_vm1, %v3711_v13, %v3712_v36 }
 0x3fb   : > { %1824 = vmatpush1.bf16.msra.mxu1 %v1705_v3  ;;  %v1593_v31 = vsel %vm502_vm3, %v3677_v34, %v3716_v43  ;;  %v1592_v35 = vsel %vm502_vm3, %v3716_v43, %v3717_v55  ;;  %v1719_v5 = vpack.c.bf16 %v1636_v42, %v1615_v18  ;;  %v3692_v34 = vunpack.i.h.bf16 %v5117_v32 }
 0x3fc   : > { %v3720_v52 = vpop.permute.xlu1 %3719  ;;  %v3725_v29 = vpop.permute.xlu0 %3724  ;;  %1866 = vmatprep.subr.bf16.mxu0 %v1708_v56  ;;  %v1713_v48 = vpack.c.bf16 %v1593_v31, %v1572_v51  ;;  %v3702_v21 = vunpack.i.h.bf16 %v5142_v41  ;;  %v3701_v3 = vunpack.i.l.bf16 %v5142_v41  ;;  %v1714_v38 = vpack.c.bf16 %v1592_v35, %v1571_v61 }
 0x3fd   : > { %v3721_v63 = vunpack.i.l.bf16 %v3720_v52  ;;  %v3726_v6 = vunpack.i.l.bf16 %v3725_v29  ;;  %1867 = vmatpush1.bf16.msra.mxu0 %v1707_v14  ;;  %v3722_v43 = vunpack.i.h.bf16 %v3720_v52  ;;  %v3727_v50 = vunpack.i.h.bf16 %v3725_v29 }
 0x3fe   : > { %1825 = vmatprep.subr.bf16.mxu1 %v1713_v48  ;;  %v1657_v13 = vsel %vm568_vm6, %v3652_v44, %v3692_v34  ;;  %v1678_v41 = vsel %vm590_vm10, %v3657_v20, %v3697_v27  ;;  %v1698_v56 = vsel %vm612_vm14, %v3701_v3, %v3702_v21  ;;  %v1677_v14 = vsel %vm590_vm10, %v3697_v27, %v5144_v33 }
 0x3ff   : > { %1826 = vmatpush1.bf16.msra.mxu1 %v1712_v58  ;;  %v1614_v57 = vsel %vm524_vm4, %v3682_v37, %v3721_v63  ;;  %v1635_v40 = vsel %vm546_vm5, %v3687_v22, %v3726_v6  ;;  %v1699_v45 = vsel %vm612_vm14, %v5049_v60, %v3701_v3  ;;  %v1613_v30 = vsel %vm524_vm4, %v3721_v63, %v3722_v43 }
 0x400   : > { %v5204_v23 = vpop.permute.xlu1 %1568  ;;  %v5206_v11 = vpop.permute.xlu0 %1589  ;;  %v1720_v15 = vpack.c.bf16 %v1635_v40, %v1614_v57  ;;  %v1634_v44 = vsel %vm546_vm5, %v3726_v6, %v3727_v50  ;;  %v1726_v52 = vpack.c.bf16 %v1678_v41, %v1657_v13  ;;  %v1734_v58 = vpack.c.bf16 %v1698_v56, %v1698_v56 }
 0x401   : > { %v1570_v47 = vsel %vm480_vm1, %v3712_v36, %v5204_v23  ;;  %v1591_v19 = vsel %vm502_vm3, %v3717_v55, %v5206_v11  ;;  %v1733_v42 = vpack.c.bf16 %v1699_v45, %v1699_v45  ;;  %v1721_v63 = vpack.c.bf16 %v1634_v44, %v1613_v30 }
 0x402   : > { %v1715_v62 = vpack.c.bf16 %v1591_v19, %v1570_v47  ;;  %1827 = vmatprep.subr.bf16.mxu1 %v1720_v15  ;;  %v1576_v3 = vsel %vm480_vm1, %v5204_v23, %v3671_v39  ;;  %vm2939_vm1 = vcmask 80896  }
 0x403   : > { %1828 = vmatpush1.bf16.msra.mxu1 %v1719_v5  ;;  %v1555_v5 = vsel %vm458_vm0, %v5164_v53, %v3666_v4  ;;  %v1766_v19 = vsel %vm791_vm7, %v1733_v42, 0 }
 0x404   : > { %v3730_v1 = vpop.permute.xlu1 %3729  ;;  %v5220_v37 = vpop.permute.xlu0 %1631  ;;  %1868 = vmatprep.subr.bf16.mxu0 %v1715_v62  ;;  %v1709_v62 = vpack.c.bf16 %v1555_v5, %v4994_v24 }
 0x405   : > { %v3731_v22 = vunpack.i.l.bf16 %v3730_v1  ;;  %1869 = vmatpush1.bf16.msra.mxu0 %v1714_v38  ;;  %v1633_v29 = vsel %vm546_vm5, %v3727_v50, %v5220_v37  ;;  %v3732_v18 = vunpack.i.h.bf16 %v3730_v1  ;;  %v1597_v38 = vsel %vm502_vm3, %v5206_v11, %v3676_v10 }
 0x406   : > { %v1716_v2 = vpack.c.bf16 %v1597_v38, %v1576_v3  ;;  %v1639_v10 = vsel %vm546_vm5, %v5220_v37, %v3686_v46 }
 0x407   : > { %v1656_v51 = vsel %vm568_vm6, %v3692_v34, %v3731_v22  ;;  %v1655_v47 = vsel %vm568_vm6, %v3731_v22, %v3732_v18 }
 0x408   : > { %v1611_v20 = vpop.permute.xlu1 %1610  ;;  %v1653_v31 = vpop.permute.xlu0 %1652  ;;  %v1727_v55 = vpack.c.bf16 %v1677_v14, %v1656_v51 }
 0x409   : > { %v1612_v48 = vsel %vm524_vm4, %v3722_v43, %v1611_v20  ;;  %v1654_v34 = vsel %vm568_vm6, %v3732_v18, %v1653_v31  ;;  %v1618_v12 = vsel %vm524_vm4, %v1611_v20, %v3681_v17  ;;  %v1660_v17 = vsel %vm568_vm6, %v1653_v31, %v3691_v16 }
 0x40a   : > { %v1722_v60 = vpack.c.bf16 %v1633_v29, %v1612_v48  ;;  %1829 = vmatprep.subr.bf16.mxu1 %v1727_v55  ;;  %v1723_v23 = vpack.c.bf16 %v1639_v10, %v1618_v12  ;;  %v3816_v10 = vld [vmem:[#allocation2] sm:$0xff]  }
 0x40b   : > { %1830 = vmatpush1.bf16.msra.mxu1 %v1726_v52 }
 0x40c   : > { %v3735_v36 = vpop.permute.xlu1 %3734  ;;  %v3740_v6 = vpop.permute.xlu0 %3739  ;;  %3063 = vmatprep.subr.msk.bf16.mxu1 %vm791_vm7, %v1734_v58  ;;  %1870 = vmatprep.subr.bf16.mxu0 %v1722_v60 }
 0x40d   : > { %v3737_v57 = vunpack.i.h.bf16 %v3735_v36  ;;  %v3736_v40 = vunpack.i.l.bf16 %v3735_v36  ;;  %v3742_v35 = vunpack.i.h.bf16 %v3740_v6  ;;  %v3741_v15 = vunpack.i.l.bf16 %v3740_v6  ;;  %1871 = vmatpush1.bf16.msra.mxu0 %v1721_v63 }
 0x40f   : > { %v1676_v27 = vsel %vm590_vm10, %v5144_v33, %v3736_v40  ;;  %v1696_v61 = vsel %vm612_vm14, %v3741_v15, %v3742_v35  ;;  %1832 = vmatpush1.bf16.msra.mxu1 %v1766_v19  ;;  %v1675_v25 = vsel %vm590_vm10, %v3736_v40, %v3737_v57  ;;  %v1697_v33 = vsel %vm612_vm14, %v3702_v21, %v3741_v15 }
 0x410   : > { %v1728_v4 = vpack.c.bf16 %v1676_v27, %v1655_v47  ;;  %v1729_v53 = vpack.c.bf16 %v1675_v25, %v1654_v34  ;;  %3247 = vmatprep.subr.bf16.mxu1 %v5724_v49  ;;  %v1736_v43 = vpack.c.bf16 %v1696_v61, %v1696_v61  ;;  %v1735_v24 = vpack.c.bf16 %v1697_v33, %v1697_v33 }
 0x411   : > { %v1681_v59 = vsel %vm590_vm10, %v3737_v57, %v3696_v28  ;;  %v1702_v8 = vsel %vm612_vm14, %v3742_v35, %v3661_v0 }
 0x412   : > { %3064 = vmatmul.mubr.msk.bf16.vlgmr.msra.gmra.mrb[20].mxu1 %vm1755_vm11, %v5153_v9  ;;  %1872 = vmatprep.subr.bf16.mxu0 %v1729_v53  ;;  %v1772_v39 = vsel %vm791_vm7, %v1735_v24, 0  ;;  %v1730_v46 = vpack.c.bf16 %v1681_v59, %v1660_v17  ;;  %v1737_v7 = vpack.c.bf16 %v1702_v8, %v1702_v8  ;;  %v3819_v59 = vld [vmem:[#allocation2 + $0xc0] sm:$0xff]   ;;  %v3823_v17 = vld [vmem:[#allocation2 + $0xc8] sm:$0xff]  }
 0x413   : > { %1873 = vmatpush1.bf16.msra.mxu0 %v1728_v4  ;;  %3248 = vmatpush3.bf16.msra.mxu1 %v1709_v62  ;;  %v3820_v8 = vld [vmem:[#allocation2 + $0x80] sm:$0xff]  }
 0x414   : > { %3065 = vmatprep.subr.msk.bf16.mxu0 %vm791_vm7, %v1736_v43  ;;  %3249 = vmatprep.subr.bf16.mxu1 %v5724_v49  ;;  %v1778_v28 = vsel %vm791_vm7, %v1737_v7, 0  ;;  %v3821_v7 = vld [vmem:[#allocation2 + $0x50] sm:$0xff]  }
 0x415   : > { %3257 = vmatprep.mubr.msk.bf16.mxu1 %vm3986_vm2, %v5724_v49 }
 0x417   : > { %1875 = vmatpush1.bf16.msra.mxu0 %v1772_v39  ;;  %3250 = vmatpush3.bf16.msra.mxu1 %v1716_v2  ;;  %v3815_v39 = vld [vmem:[#allocation2 + $0x40] sm:$0xff]  }
 0x418   : > { %3251 = vmatprep.subr.bf16.mxu1 %v5724_v49  ;;  %3144 = vmatprep.subr.bf16.mxu0 %v3815_v39  ;;  %v3840_v39 = vld [vmem:[#allocation2 + $0xa8] sm:$0xff]  }
 0x41a   : > { %3066 = vmatmul.mubr.msk.bf16.vlgmr.msra.gmra.mrb[16].mxu0 %vm1755_vm11, %v5153_v9 }
 0x41b   : > { %3252 = vmatpush3.bf16.msra.mxu1 %v1723_v23  ;;  %v3817_v23 = vld [vmem:[#allocation2 + $0x48] sm:$0xff]   ;;  %3145 = vmatpush3.bf16.msra.mxu0 %v3816_v10  ;;  %v3841_v10 = vld [vmem:[#allocation2 + $0x78] sm:$0xff]  }
 0x41c   : > { %3253 = vmatprep.subr.bf16.mxu1 %v5724_v49  ;;  %3146 = vmatprep.subr.bf16.mxu0 %v3817_v23 }
 0x41d   : > { %v1743_v54 = vpop.permute.xlu1 %1742  ;;  %v1748_v16 = vpop.permute.xlu0 %1747 }
 0x41f   : > { %3254 = vmatpush3.bf16.msra.mxu1 %v1730_v46  ;;  %v3818_v46 = vld [vmem:[#allocation2 + $0x8] sm:$0xff]  }
 0x420   : > { %3255 = vmatprep.subr.bf16.mxu1 %v5724_v49  ;;  %3147 = vmatpush3.bf16.msra.mxu0 %v3818_v46 }
 0x421   : > { %3148 = vmatprep.subr.bf16.mxu0 %v3821_v7 }
 0x423   : > { %3256 = vmatpush3.bf16.msra.mxu1 %v1778_v28  ;;  %v3824_v28 = vld [vmem:[#allocation2 + $0x88] sm:$0xff]  }
 0x424   : > { %3166 = vmatprep.subr.bf16.mxu1 %v3819_v59 }
 0x426   : > { %3258 = vmatmul.mubr.msk.bf16.vlgmr.msra.gmra.mrb[24].mxu1 %vm1755_vm11, %v5153_v9 }
 0x427   : > { %3167 = vmatpush3.bf16.msra.mxu1 %v3820_v8  ;;  %v3842_v8 = vld [vmem:[#allocation2 + $0x38] sm:$0xff]  }
 0x428   : > { %3168 = vmatprep.subr.bf16.mxu1 %v3823_v17 }
 0x42b   : > { %3169 = vmatpush3.bf16.msra.mxu1 %v3824_v28 }
 0x4cc   : > { %v1814_v0 = vpop.f32.mrb[12].mxu0 }
 0x4cd   : > { %v1816_v11 = vpop.f32.mrb[13].mxu0  ;;  %v5332_v45 = vadd.f32 %v1814_v0, %v1743_v54  ;;  %v3822_v0 = vld [vmem:[#allocation2 + $0x10] sm:$0xff]  }
 0x4ce   : > { %v1818_v32 = vpop.f32.mrb[14].mxu0  ;;  %v5317_v21 = vadd.f32 %v1816_v11, %v1743_v54  ;;  %v3825_v11 = vld [vmem:[#allocation2 + $0x58] sm:$0xff]   ;;  %3149 = vmatpush3.bf16.msra.mxu0 %v3822_v0 }
 0x4cf   : > { %v1820_v50 = vpop.f32.mrb[15].mxu0  ;;  %v5334_v30 = vadd.f32 %v1818_v32, %v1748_v16  ;;  %v1950_v58 = vmax.f32 %v5332_v45, 0.0  ;;  %v3828_v32 = vld [vmem:[#allocation2 + $0x90] sm:$0xff]   ;;  %3150 = vmatprep.subr.bf16.mxu0 %v3825_v11 }
 0x4d0   : > { %v5319_v1 = vadd.f32 %v1820_v50, %v1748_v16  ;;  %v1951_v37 = vmax.f32 %v5317_v21, 0.0  ;;  %v3826_v50 = vld [vmem:[#allocation2 + $0x18] sm:$0xff]   ;;  %v3843_v11 = vld [vmem:[#allocation2 + $0xf0] sm:$0xff]  }
 0x4d1   : > { %v1957_v18 = vmax.f32 %v5334_v30, 0.0 }
 0x4d2   : > { %v1958_v22 = vmax.f32 %v5319_v1, 0.0  ;;  %3151 = vmatpush3.bf16.msra.mxu0 %v3826_v50 }
 0x4d3   : > { %v3759_v35 = vpack.i.bf16 %v1957_v18, %v1950_v58 }
 0x4d4   : > { %v3744_v13 = vpack.i.bf16 %v1958_v22, %v1951_v37 }
 0x4d6   : > { %3745 = vrot.lane.b32.xlu1 %v3744_v13, %s3976_s30  ;;  %v3829_v13 = vld [vmem:[#allocation2 + $0x60] sm:$0xff]  }
 0x4d7   : > { %3152 = vmatprep.subr.bf16.mxu0 %v3829_v13 }
 0x4e5   : > { %v1857_v9 = vpop.f32.mrb[20].mxu1 }
 0x4e6   : > { %v5328_v41 = vadd.f32 %v1857_v9, %v1743_v54  ;;  %v1859_v56 = vpop.f32.mrb[21].mxu1  ;;  %v3832_v9 = vld [vmem:[#allocation2 + $0x98] sm:$0xff]  }
 0x4e7   : > { %v5330_v14 = vadd.f32 %v1859_v56, %v1743_v54  ;;  %v1861_v51 = vpop.f32.mrb[22].mxu1  ;;  %v3830_v56 = vld [vmem:[#allocation2 + $0x20] sm:$0xff]  }
 0x4e8   : > { %v1952_v44 = vmax.f32 %v5328_v41, 0.0  ;;  %v5337_v20 = vadd.f32 %v1861_v51, %v1748_v16  ;;  %v1863_v31 = vpop.f32.mrb[23].mxu1  ;;  %v3833_v51 = vld [vmem:[#allocation2 + $0x68] sm:$0xff]   ;;  %3153 = vmatpush3.bf16.msra.mxu0 %v3830_v56 }
 0x4e9   : > { %v5339_v55 = vadd.f32 %v1863_v31, %v1748_v16  ;;  %v1953_v29 = vmax.f32 %v5330_v14, 0.0  ;;  %v3834_v31 = vld [vmem:[#allocation2 + $0x28] sm:$0xff]   ;;  %3154 = vmatprep.subr.bf16.mxu0 %v3833_v51 }
 0x4ea   : > { %v1959_v52 = vmax.f32 %v5337_v20, 0.0 }
 0x4eb   : > { %v1960_v48 = vmax.f32 %v5339_v55, 0.0 }
 0x4ec   : > { %v3749_v60 = vpack.i.bf16 %v1959_v52, %v1952_v44  ;;  %3155 = vmatpush3.bf16.msra.mxu0 %v3834_v31 }
 0x4ed   : > { %v3754_v42 = vpack.i.bf16 %v1960_v48, %v1953_v29  ;;  %v1900_v63 = vpop.f32.mrb[16].mxu0 }
 0x4ee   : > { %v5354_v36 = vadd.f32 %v1900_v63, %v1743_v54  ;;  %3750 = vrot.lane.b32.xlu0 %v3749_v60, %s3976_s30  ;;  %v1902_v6 = vpop.f32.mrb[17].mxu0  ;;  %v3835_v60 = vld [vmem:[#allocation2 + $0xe0] sm:$0xff]  }
 0x4ef   : > { %v5357_v57 = vadd.f32 %v1902_v6, %v1743_v54  ;;  %v1904_v40 = vpop.f32.mrb[18].mxu0  ;;  %3755 = vrot.lane.b32.xlu1 %v3754_v42, %s3976_s30  ;;  %v3836_v63 = vld [vmem:[#allocation2 + $0xa0] sm:$0xff]   ;;  %v3837_v6 = vld [vmem:[#allocation2 + $0x70] sm:$0xff]  }
 0x4f0   : > { %v5364_v15 = vadd.f32 %v1904_v40, %v1748_v16  ;;  %v1906_v5 = vpop.f32.mrb[19].mxu0  ;;  %v1954_v19 = vmax.f32 %v5354_v36, 0.0  ;;  %v3838_v40 = vld [vmem:[#allocation2 + $0x30] sm:$0xff]   ;;  %3156 = vmatprep.subr.bf16.mxu0 %v3837_v6 }
 0x4f1   : > { %v5366_v47 = vadd.f32 %v1906_v5, %v1748_v16  ;;  %v1955_v27 = vmax.f32 %v5357_v57, 0.0  ;;  %3157 = vmatpush3.bf16.msra.mxu0 %v3838_v40 }
 0x4f2   : > { %v1961_v34 = vmax.f32 %v5364_v15, 0.0  ;;  %3760 = vrot.lane.b32.xlu0 %v3759_v35, %s3976_s30  ;;  %3158 = vmatprep.subr.bf16.mxu0 %v3841_v10 }
 0x4f3   : > { %v1962_v61 = vmax.f32 %v5366_v47, 0.0  ;;  %v401_v47 = vld [vmem:[%s5702_s7 + $0x20] sm:$0xff] }
 0x4f4   : > { %v3764_v25 = vpack.i.bf16 %v1961_v34, %v1954_v19 }
 0x4f5   : > { %v3769_v4 = vpack.i.bf16 %v1962_v61, %v1955_v27  ;;  %3159 = vmatpush3.bf16.msra.mxu0 %v3842_v8 }
 0x4f6   : > { %3765 = vrot.lane.b32.xlu1 %v3764_v25, %s3976_s30 }
 0x4f7   : > { %3770 = vrot.lane.b32.xlu0 %v3769_v4, %s3976_s30 }
 0x4f9   : > { %v1943_v53 = vpop.f32.mrb[24].mxu1 }
 0x4fa   : > { %v5383_v62 = vadd.f32 %v1943_v53, %v1743_v54  ;;  %v3259_v3 = vpop.f32.mrb[25].mxu1  ;;  %v3827_v54 = vld [vmem:[#allocation2 + $0xd0] sm:$0xff]  }
 0x4fb   : > { %v1946_v33 = vpop.f32.mrb[26].mxu1  ;;  %3170 = vmatprep.subr.bf16.mxu1 %v3827_v54 }
 0x4fc   : > { %v5385_v38 = vadd.f32 %v1946_v33, %v1748_v16  ;;  %v3260_v43 = vpop.f32.mrb[27].mxu1  ;;  %v1956_v24 = vmax.f32 %v5383_v62, 0.0  ;;  %v3831_v16 = vld [vmem:[#allocation2 + $0xd8] sm:$0xff]   ;;  %3171 = vmatpush3.bf16.msra.mxu1 %v3828_v32  ;;  %v3844_v32 = vld [vmem:[#allocation2 + $0xb0] sm:$0xff]  }
 0x4fd   : > { %3172 = vmatprep.subr.bf16.mxu1 %v3831_v16  ;;  %v3845_v16 = vld [vmem:[#allocation2 + $0x140] sm:$0xff]  }
 0x4fe   : > { %v1963_v2 = vmax.f32 %v5385_v38, 0.0  ;;  %3188 = vmatprep.subr.bf16.mxu0 %v3845_v16 }
 0x500   : > { %v3774_v12 = vpack.i.bf16 %v1963_v2, %v1956_v24  ;;  %3173 = vmatpush3.bf16.msra.mxu1 %v3832_v9 }
 0x501   : > { %3174 = vmatprep.subr.bf16.mxu1 %v3835_v60  ;;  %v3848_v60 = vld [vmem:[#allocation2 + $0xb8] sm:$0xff]  }
 0x502   : > { %3775 = vrot.lane.b32.xlu1 %v3774_v12, %s3976_s30  ;;  %v3839_v12 = vld [vmem:[#allocation2 + $0xe8] sm:$0xff]  }
 0x504   : > { %3175 = vmatpush3.bf16.msra.mxu1 %v3836_v63 }
 0x505   : > { %3176 = vmatprep.subr.bf16.mxu1 %v3839_v12 }
 0x508   : > { %3177 = vmatpush3.bf16.msra.mxu1 %v3840_v39 }
 0x509   : > { %3178 = vmatprep.subr.bf16.mxu1 %v3843_v11 }
 0x50c   : > { %3179 = vmatpush3.bf16.msra.mxu1 %v3844_v32 }
 0x548   : > { %v3746_v42 = vpop.permute.xlu1 %3745 }
 0x549   : > { %v3748_v5 = vunpack.i.h.bf16 %v3746_v42  ;;  %v3747_v25 = vunpack.i.l.bf16 %v3746_v42 }
 0x560   : > { %v3751_v35 = vpop.permute.xlu0 %3750 }
 0x561   : > { %v3753_v4 = vunpack.i.h.bf16 %v3751_v35  ;;  %v3752_v53 = vunpack.i.l.bf16 %v3751_v35  ;;  %v3756_v3 = vpop.permute.xlu1 %3755 }
 0x562   : > { %v3758_v33 = vunpack.i.h.bf16 %v3756_v3  ;;  %v3757_v43 = vunpack.i.l.bf16 %v3756_v3 }
 0x563   : > { %v2000_v23 = vsel %vm458_vm0, %v3747_v25, %v3752_v53  ;;  %v2001_v59 = vsel %vm458_vm0, %v3748_v5, %v3753_v4 }
 0x564   : > { %v5400_v17 = vmax.f32 %v1951_v37, %v2000_v23  ;;  %v5404_v46 = vmax.f32 %v1958_v22, %v2001_v59  ;;  %v1999_v7 = vsel %vm458_vm0, %v3753_v4, %v3758_v33  ;;  %v1998_v28 = vsel %vm458_vm0, %v3752_v53, %v3757_v43  ;;  %v3761_v54 = vpop.permute.xlu0 %3760 }
 0x565   : > { %v5412_v0 = vmax.f32 %v1959_v52, %v1999_v7  ;;  %v5416_v21 = vmax.f32 %v1952_v44, %v1998_v28  ;;  %v3763_v37 = vunpack.i.h.bf16 %v3761_v54  ;;  %v3762_v1 = vunpack.i.l.bf16 %v3761_v54  ;;  %v3847_v44 = vld [vmem:[#allocation2 + $0xf8] sm:$0xff]  }
 0x566   : > { %v3779_v22 = vpack.i.bf16 %v5404_v46, %v5400_v17  ;;  %3180 = vmatprep.subr.bf16.mxu1 %v3847_v44 }
 0x567   : > { %v2003_v20 = vsel %vm458_vm0, %v3763_v37, %v3748_v5  ;;  %v2002_v52 = vsel %vm458_vm0, %v3762_v1, %v3747_v25  ;;  %v3784_v41 = vpack.i.bf16 %v5412_v0, %v5416_v21  ;;  %3181 = vmatpush3.bf16.msra.mxu1 %v3848_v60 }
 0x568   : > { %v5428_v50 = vmax.f32 %v1957_v18, %v2003_v20  ;;  %v5432_v13 = vmax.f32 %v1950_v58, %v2002_v52  ;;  %v3766_v9 = vpop.permute.xlu1 %3765  ;;  %3780 = vrot.lane.b32.xlu0 %v3779_v22, %s3977_s14  ;;  %3261 = vmatprep.subr.bf16.mxu1 %v5724_v49  ;;  %v3846_v20 = vld [vmem:[#allocation2 + $0x100] sm:$0xff]  }
 0x569   : > { %v3768_v56 = vunpack.i.h.bf16 %v3766_v9  ;;  %v3767_v51 = vunpack.i.l.bf16 %v3766_v9  ;;  %3785 = vrot.lane.b32.xlu1 %v3784_v41, %s3977_s14  ;;  %v3771_v31 = vpop.permute.xlu0 %3770  ;;  %v3849_v9 = vld [vmem:[#allocation2 + $0x148] sm:$0xff]  }
 0x56a   : > { %v3773_v42 = vunpack.i.h.bf16 %v3771_v31  ;;  %v3772_v63 = vunpack.i.l.bf16 %v3771_v31  ;;  %v3789_v30 = vpack.i.bf16 %v5428_v50, %v5432_v13 }
 0x56b   : > { %v1996_v45 = vsel %vm458_vm0, %v3757_v43, %v3767_v51  ;;  %v1997_v58 = vsel %vm458_vm0, %v3758_v33, %v3768_v56 }
 0x56c   : > { %v5444_v18 = vmax.f32 %v1953_v29, %v1996_v45  ;;  %v5448_v6 = vmax.f32 %v1960_v48, %v1997_v58  ;;  %v1995_v40 = vsel %vm458_vm0, %v3768_v56, %v3773_v42  ;;  %v1994_v35 = vsel %vm458_vm0, %v3767_v51, %v3772_v63  ;;  %3790 = vrot.lane.b32.xlu0 %v3789_v30, %s3977_s14  ;;  %v3851_v45 = vld [vmem:[#allocation2 + $0x180] sm:$0xff]  }
 0x56d   : > { %v5457_v5 = vmax.f32 %v1961_v34, %v1995_v40  ;;  %v5461_v14 = vmax.f32 %v1954_v19, %v1994_v35  ;;  %v3853_v40 = vld [vmem:[#allocation2 + $0x110] sm:$0xff]   ;;  %v3855_v35 = vld [vmem:[#allocation2 + $0x158] sm:$0xff]  }
 0x56e   : > { %v3794_v55 = vpack.i.bf16 %v5448_v6, %v5444_v18 }
 0x56f   : > { %v3799_v29 = vpack.i.bf16 %v5457_v5, %v5461_v14 }
 0x570   : > { %3795 = vrot.lane.b32.xlu1 %v3794_v55, %s3977_s14  ;;  %v3854_v55 = vld [vmem:[#allocation2 + $0x188] sm:$0xff]  }
 0x571   : > { %3800 = vrot.lane.b32.xlu0 %v3799_v29, %s3977_s14 }
 0x574   : > { %v3776_v48 = vpop.permute.xlu1 %3775 }
 0x575   : > { %v3778_v15 = vunpack.i.h.bf16 %v3776_v48  ;;  %v3777_v34 = vunpack.i.l.bf16 %v3776_v48 }
 0x577   : > { %v1992_v36 = vsel %vm458_vm0, %v3772_v63, %v3777_v34  ;;  %v1993_v19 = vsel %vm458_vm0, %v3773_v42, %v3778_v15  ;;  %v2004_v25 = vsel %vm458_vm0, %v3777_v34, %v3762_v1  ;;  %v2005_v4 = vsel %vm458_vm0, %v3778_v15, %v3763_v37  ;;  %v3850_v42 = vld [vmem:[#allocation2 + $0x108] sm:$0xff]  }
 0x578   : > { %v5480_v53 = vmax.f32 %v1955_v27, %v1992_v36  ;;  %v5484_v3 = vmax.f32 %v1956_v24, %v2004_v25  ;;  %v5488_v33 = vmax.f32 %v1962_v61, %v1993_v19  ;;  %v5492_v43 = vmax.f32 %v1963_v2, %v2005_v4  ;;  %v3856_v36 = vld [vmem:[#allocation2 + $0x118] sm:$0xff]   ;;  %v3858_v19 = vld [vmem:[#allocation2 + $0x160] sm:$0xff]  }
 0x579   : > { %vm2702_vm0 = vcmask 130048  }
 0x57a   : > { %v3804_v12 = vpack.i.bf16 %v5488_v33, %v5480_v53  ;;  %v3809_v57 = vpack.i.bf16 %v5492_v43, %v5484_v3 }
 0x57c   : > { %3805 = vrot.lane.b32.xlu1 %v3804_v12, %s3977_s14  ;;  %3810 = vrot.lane.b32.xlu0 %v3809_v57, %s3977_s14  ;;  %v3857_v12 = vld [vmem:[#allocation2 + $0x190] sm:$0xff]   ;;  %v3859_v57 = vld [vmem:[#allocation2 + $0x120] sm:$0xff]  }
 0x580   : > { %2699 = vperm.xlu1 %3743, %v401_v47  }
 0x5da   : > { %v3781_v27 = vpop.permute.xlu0 %3780 }
 0x5db   : > { %v3783_v61 = vunpack.i.h.bf16 %v3781_v27  ;;  %v3782_v62 = vunpack.i.l.bf16 %v3781_v27  ;;  %v3786_v38 = vpop.permute.xlu1 %3785 }
 0x5dc   : > { %v3788_v24 = vunpack.i.h.bf16 %v3786_v38  ;;  %v3787_v2 = vunpack.i.l.bf16 %v3786_v38  ;;  %v3860_v38 = vld [vmem:[#allocation2 + $0x198] sm:$0xff]  }
 0x5de   : > { %v2056_v39 = vsel %vm502_vm3, %v3782_v62, %v3787_v2  ;;  %v2057_v10 = vsel %vm502_vm3, %v3783_v61, %v3788_v24  ;;  %v5507_v23 = vpop.permute.xlu0 %3790 }
 0x5df   : > { %v3793_v59 = vunpack.i.h.bf16 %v5507_v23  ;;  %v3792_v8 = vunpack.i.l.bf16 %v5507_v23  ;;  %v2063_v7 = vmax.f32 %v5400_v17, %v2056_v39  ;;  %v2070_v28 = vmax.f32 %v5404_v46, %v2057_v10  ;;  %v3863_v39 = vld [vmem:[#allocation2 + $0x1a0] sm:$0xff]  }
 0x5e1   : > { %v2059_v54 = vsel %vm502_vm3, %v3793_v59, %v3783_v61  ;;  %v2058_v37 = vsel %vm502_vm3, %v3792_v8, %v3782_v62  ;;  %v2077_v1 = vpack.c.bf16 %v2070_v28, %v2063_v7  ;;  %v3861_v61 = vld [vmem:[#allocation2 + $0x168] sm:$0xff]  }
 0x5e2   : > { %v2069_v22 = vmax.f32 %v5428_v50, %v2059_v54  ;;  %v2062_v11 = vmax.f32 %v5432_v13, %v2058_v37  ;;  %v3796_v32 = vpop.permute.xlu1 %3795  ;;  %v3866_v28 = vld [vmem:[#allocation2 + $0x1a8] sm:$0xff]   ;;  %v3868_v54 = vld [vmem:[#allocation2 + $0x138] sm:$0xff]  }
 0x5e3   : > { %v3798_v16 = vunpack.i.h.bf16 %v3796_v32  ;;  %v3797_v17 = vunpack.i.l.bf16 %v3796_v32  ;;  %2563 = vmatprep.mubr.bf16.mxu0 %v2077_v1  ;;  %v5523_v46 = vpop.permute.xlu0 %3800 }
 0x5e4   : > { %v3803_v52 = vunpack.i.h.bf16 %v5523_v46  ;;  %v3802_v41 = vunpack.i.l.bf16 %v5523_v46  ;;  %v2076_v44 = vpack.c.bf16 %v2069_v22, %v2062_v11  ;;  %v3869_v22 = vld [vmem:[#allocation2 + $0x1b0] sm:$0xff]  }
 0x5e5   : > { %v2055_v56 = vsel %vm502_vm3, %v3788_v24, %v3798_v16  ;;  %v2054_v50 = vsel %vm502_vm3, %v3787_v2, %v3797_v17  ;;  %v3862_v24 = vld [vmem:[#allocation2 + $0x128] sm:$0xff]   ;;  %v3864_v2 = vld [vmem:[#allocation2 + $0x170] sm:$0xff]  }
 0x5e6   : > { %v2071_v13 = vmax.f32 %v5412_v0, %v2055_v56  ;;  %v2064_v51 = vmax.f32 %v5416_v21, %v2054_v50  ;;  %v2053_v31 = vsel %vm502_vm3, %v3798_v16, %v3803_v52  ;;  %v2052_v60 = vsel %vm502_vm3, %v3797_v17, %v3802_v41  ;;  %2564 = vmatmul.mubr.bf16.vlgmr.msra.gmra.mrb[20].mxu0 %v2076_v44  ;;  %v3852_v0 = vld [vmem:[#allocation2 + $0x150] sm:$0xff]  }
 0x5e7   : > { %3189 = vmatpush3.bf16.msra.mxu0 %v3846_v20  ;;  %v2065_v63 = vmax.f32 %v5444_v18, %v2052_v60  ;;  %v2072_v30 = vmax.f32 %v5448_v6, %v2053_v31 }
 0x5e8   : > { %3190 = vmatprep.subr.bf16.mxu0 %v3849_v9  ;;  %v2078_v58 = vpack.c.bf16 %v2071_v13, %v2064_v51 }
 0x5e9   : > { %v2079_v21 = vpack.c.bf16 %v2072_v30, %v2065_v63 }
 0x5eb   : > { %3191 = vmatpush3.bf16.msra.mxu0 %v3850_v42  ;;  %2604 = vmatprep.mubr.bf16.mxu1 %v2079_v21 }
 0x5ec   : > { %2605 = vmatmul.mubr.bf16.vlgmr.msra.gmra.mrb[28].mxu1 %v2078_v58  ;;  %3192 = vmatprep.subr.bf16.mxu0 %v3852_v0 }
 0x5ed   : > { %3262 = vmatpush3.bf16.msra.mxu1 %v3851_v45  ;;  %3277 = vmatprep.mubr.msk.bf16.mxu1 %vm3986_vm2, %v5724_v49 }
 0x5ee   : > { %v3806_v29 = vpop.permute.xlu1 %3805  ;;  %v3811_v18 = vpop.permute.xlu0 %3810  ;;  %3263 = vmatprep.subr.bf16.mxu1 %v5724_v49 }
 0x5ef   : > { %v3808_v6 = vunpack.i.h.bf16 %v3806_v29  ;;  %v3807_v48 = vunpack.i.l.bf16 %v3806_v29  ;;  %v3813_v15 = vunpack.i.h.bf16 %v3811_v18  ;;  %v3812_v34 = vunpack.i.l.bf16 %v3811_v18  ;;  %3193 = vmatpush3.bf16.msra.mxu0 %v3853_v40 }
 0x5f0   : > { %3194 = vmatprep.subr.bf16.mxu0 %v3855_v35 }
 0x5f1   : > { %v2049_v25 = vsel %vm502_vm3, %v3808_v6, %v3813_v15  ;;  %v2048_v4 = vsel %vm502_vm3, %v3807_v48, %v3812_v34  ;;  %3264 = vmatpush3.bf16.msra.mxu1 %v3854_v55  ;;  %v2050_v10 = vsel %vm502_vm3, %v3802_v41, %v3807_v48  ;;  %v2051_v7 = vsel %vm502_vm3, %v3803_v52, %v3808_v6  ;;  %v2695_v6 = vld [vmem:[%s5699_s4] sm:$0x3] }
 0x5f2   : > { %3265 = vmatprep.subr.bf16.mxu1 %v5724_v49  ;;  %v2067_v47 = vmax.f32 %v5480_v53, %v2048_v4  ;;  %v2074_v27 = vmax.f32 %v5488_v33, %v2049_v25  ;;  %v3865_v53 = vld [vmem:[#allocation2 + $0x130] sm:$0xff]   ;;  %v3867_v33 = vld [vmem:[#allocation2 + $0x178] sm:$0xff]   ;;  %v2066_v37 = vmax.f32 %v5461_v14, %v2050_v10  ;;  %v2073_v1 = vmax.f32 %v5457_v5, %v2051_v7 }
 0x5f3   : > { %3195 = vmatpush3.bf16.msra.mxu0 %v3856_v36  ;;  %v2060_v11 = vsel %vm502_vm3, %v3812_v34, %v3792_v8  ;;  %v2061_v32 = vsel %vm502_vm3, %v3813_v15, %v3793_v59  ;;  %v3870_v5 = vld [vmem:[#allocation2 + $0x1b8] sm:$0xff]   ;;  %vm2961_vm3 = vcmask 73728  }
 0x5f4   : > { %3196 = vmatprep.subr.bf16.mxu0 %v3858_v19  ;;  %v2081_v62 = vpack.c.bf16 %v2074_v27, %v2067_v47  ;;  %v2080_v16 = vpack.c.bf16 %v2073_v1, %v2066_v37  ;;  %v2068_v14 = vmax.f32 %v5484_v3, %v2060_v11  ;;  %v2075_v17 = vmax.f32 %v5492_v43, %v2061_v32 }
 0x5f5   : > { %3266 = vmatpush3.bf16.msra.mxu1 %v3857_v12  ;;  %v402_v12 = vld [vmem:[%s5702_s7 + $0x28] sm:$0xff] }
 0x5f6   : > { %3267 = vmatprep.subr.bf16.mxu1 %v5724_v49  ;;  %2645 = vmatprep.mubr.bf16.mxu0 %v2081_v62  ;;  %v2082_v23 = vpack.c.bf16 %v2075_v17, %v2068_v14 }
 0x5f7   : > { %3197 = vmatpush3.bf16.msra.mxu0 %v3859_v57 }
 0x5f8   : > { %3198 = vmatprep.subr.bf16.mxu0 %v3861_v61 }
 0x5f9   : > { %3268 = vmatpush3.bf16.msra.mxu1 %v3860_v38 }
 0x5fa   : > { %3269 = vmatprep.subr.bf16.mxu1 %v5724_v49 }
 0x5fb   : > { %3199 = vmatpush3.bf16.msra.mxu0 %v3862_v24 }
 0x5fc   : > { %3200 = vmatprep.subr.bf16.mxu0 %v3864_v2 }
 0x5fd   : > { %3270 = vmatpush3.bf16.msra.mxu1 %v3863_v39 }
 0x5fe   : > { %3271 = vmatprep.subr.bf16.mxu1 %v5724_v49 }
 0x5ff   : > { %3201 = vmatpush3.bf16.msra.mxu0 %v3865_v53  ;;  %v2700_v48 = vpop.permute.xlu1 %2699 }
 0x600   : > { %3202 = vmatprep.subr.bf16.mxu0 %v3867_v33 }
 0x601   : > { %3272 = vmatpush3.bf16.msra.mxu1 %v3866_v28 }
 0x602   : > { %3273 = vmatprep.subr.bf16.mxu1 %v5724_v49 }
 0x603   : > { %3203 = vmatpush3.bf16.msra.mxu0 %v3868_v54 }
 0x604   : > { %3281 = vmatprep.subr.bf16.mxu0 %v5724_v49 }
 0x605   : > { %3274 = vmatpush3.bf16.msra.mxu1 %v3869_v22 }
 0x606   : > { %2646 = vmatmul.mubr.bf16.vlgmr.msra.gmra.mrb[24].mxu0 %v2080_v16  ;;  %3275 = vmatprep.subr.bf16.mxu1 %v5724_v49  ;;  %v2782_v16 = vld [vmem:[%s5700_s5] sm:$0xf] }
 0x607   : > { %3283 = vmatprep.mubr.msk.bf16.mxu0 %vm3986_vm2, %v5724_v49 }
 0x609   : > { %3276 = vmatpush3.bf16.msra.mxu1 %v3870_v5 }
 0x60a   : > { %3287 = vmatprep.subr.bf16.mxu1 %v5724_v49 }
 0x60c   : > { %3278 = vmatmul.mubr.bf16.vlgmr.msra.gmra.mrb[32].mxu1 %v2082_v23 }
 0x60d   : > { %3293 = vmatprep.mubr.msk.bf16.mxu1 %vm3986_vm2, %v5724_v49 }
 0x6b9   : > { %v3160_v26 = vpop.f32.mrb[20].mxu0 }
 0x6ba   : > { %v3161_v59 = vpop.f32.mrb[21].mxu0 }
 0x6bb   : > { %v3162_v8 = vadd.f32 %v3161_v59, %v3160_v26  ;;  %v3163_v3 = vpop.f32.mrb[22].mxu0 }
 0x6bc   : > { %v3164_v46 = vpop.f32.mrb[23].mxu0 }
 0x6bd   : > { %v3165_v43 = vadd.f32 %v3164_v46, %v3163_v3  ;;  %v404_v3 = vld [vmem:[%s5702_s7 + $0x38] sm:$0xff]  ;;  %v403_v46 = vld [vmem:[%s5702_s7 + $0x30] sm:$0xff] }
 0x6bf   : > { %v3182_v20 = vpop.f32.mrb[28].mxu1 }
 0x6c0   : > { %v3183_v52 = vpop.f32.mrb[29].mxu1 }
 0x6c1   : > { %v3184_v41 = vadd.f32 %v3183_v52, %v3182_v20  ;;  %v3185_v44 = vpop.f32.mrb[30].mxu1 }
 0x6c2   : > { %v3186_v9 = vpop.f32.mrb[31].mxu1 }
 0x6c3   : > { %v2607_v56 = vadd.f32 %v3184_v41, %v3162_v8  ;;  %v3187_v50 = vadd.f32 %v3186_v9, %v3185_v44 }
 0x6c5   : > { %v2610_v13 = vadd.f32 %v3187_v50, %v3165_v43 }
 0x6d9   : > { %v3204_v51 = vpop.f32.mrb[24].mxu0 }
 0x6da   : > { %v3205_v31 = vpop.f32.mrb[25].mxu0 }
 0x6db   : > { %v3206_v60 = vadd.f32 %v3205_v31, %v3204_v51  ;;  %v3207_v42 = vpop.f32.mrb[26].mxu0 }
 0x6dc   : > { %v3208_v63 = vpop.f32.mrb[27].mxu0 }
 0x6dd   : > { %v3209_v30 = vadd.f32 %v3208_v63, %v3207_v42  ;;  %v2648_v0 = vadd.f32 %v3206_v60, %v2607_v56 }
 0x6df   : > { %v2688_v21 = vpop.f32.mrb[32].mxu1  ;;  %v2651_v45 = vadd.f32 %v3209_v30, %v2610_v13  ;;  %v3871_v30 = vld [vmem:[%s5701_s6] sm:$0xff]  }
 0x6e0   : > { %v2689_v58 = vadd.f32 %v2688_v21, %v2648_v0  ;;  %v3279_v40 = vpop.f32.mrb[33].mxu1 }
 0x6e1   : > { %v2691_v35 = vpop.f32.mrb[34].mxu1 }
 0x6e2   : > { %v2692_v55 = vadd.f32 %v2691_v35, %v2651_v45  ;;  %v3280_v29 = vpop.f32.mrb[35].mxu1  ;;  %v3128_v35 = vld [vmem:[%s5705_s10] ss:$0 sm:$0xff] }
 0x6e4   : > { %v2696_v18 = vpack.c.bf16 %v2692_v55, %v2689_v58 }
 0x6e6   : > { %3282 = vmatpush3.bf16.msra.mxu0 %v2696_v18 }
 0x6e7   : > { %3297 = vmatprep.subr.bf16.mxu0 %v5724_v49 }
 0x6e9   : > { %3284 = vmatmul.mubr.msk.bf16.vlgmr.msra.gmra.mrb[28].mxu0 %vm2702_vm0, %v2695_v6 }
 0x6ea   : > { %3307 = vmatprep.mubr.msk.bf16.mxu0 %vm3986_vm2, %v5724_v49 }
 0x7bc   : > { %v2740_v15 = vpop.f32.mrb[28].mxu0 }
 0x7bd   : > { %v2741_v34 = vadd.f32 %v2740_v15, %v2700_v48  ;;  %v3285_v36 = vpop.f32.mrb[29].mxu0 }
 0x7be   : > { %v2743_v19 = vpop.f32.mrb[30].mxu0 }
 0x7bf   : > { %v2746_v25 = vmax.f32 %v2741_v34, 0.0  ;;  %v3286_v4 = vpop.f32.mrb[31].mxu0  ;;  %v2935_v34 = vld [vmem:[%s5703_s8] sm:$0xff]  ;;  %v2936_v19 = vld [vmem:[%s5703_s8 + $0x8] sm:$0xff] }
 0x7c1   : > { %2751 = vrot.lane.b32.xlu1 %v2746_v25, %s3987_s12  ;;  %2747 = vrot.lane.b32.xlu0 %v2746_v25, %s3976_s30 }
 0x7c5   : > { %2755 = vrot.lane.b32.xlu1 %v2746_v25, %s3988_s16  ;;  %2749 = vrot.lane.b32.xlu0 %v2746_v25, %s3975_s25 }
 0x7c9   : > { %2753 = vrot.lane.b32.xlu1 %v2746_v25, %s3989_s22  ;;  %2759 = vrot.lane.b32.xlu0 %v2746_v25, %s3990_s15 }
 0x7cd   : > { %2761 = vrot.lane.b32.xlu1 %v2746_v25, %s3991_s24  ;;  %2757 = vrot.lane.b32.xlu0 %v2746_v25, %s3992_s26 }
 0x7d1   : > { %2785 = vperm.xlu0 %3502, %v402_v12  }
 0x833   : > { %v2752_v57 = vpop.permute.xlu1 %2751  ;;  %v2748_v47 = vpop.permute.xlu0 %2747 }
 0x834   : > { %v2764_v27 = vrot.slane %v2748_v47, 4  ;;  %v2767_v61 = vrot.slane %v2752_v57, 4 }
 0x836   : > { %v2775_v24 = vsel %vm791_vm7, %v2746_v25, %v2764_v27 }
 0x837   : > { %v2756_v62 = vpop.permute.xlu1 %2755  ;;  %v2750_v38 = vpop.permute.xlu0 %2749 }
 0x838   : > { %v2776_v2 = vsel %vm791_vm7, %v2750_v38, %v2767_v61  ;;  %v2770_v10 = vrot.slane %v2756_v62, 4 }
 0x839   : > { %v2779_v39 = vpack.c.bf16 %v2776_v2, %v2775_v24 }
 0x83b   : > { %v2754_v53 = vpop.permute.xlu1 %2753  ;;  %3288 = vmatpush3.bf16.msra.mxu1 %v2779_v39  ;;  %v2760_v33 = vpop.permute.xlu0 %2759 }
 0x83c   : > { %3289 = vmatprep.subr.bf16.mxu1 %v5724_v49  ;;  %v2773_v7 = vrot.slane %v2760_v33, 4  ;;  %v2777_v37 = vsel %vm791_vm7, %v2754_v53, %v2770_v10 }
 0x83f   : > { %v2762_v28 = vpop.permute.xlu1 %2761  ;;  %v2758_v54 = vpop.permute.xlu0 %2757 }
 0x840   : > { %v2778_v1 = vsel %vm791_vm7, %v2758_v54, %v2773_v7  ;;  %v2781_v11 = vpack.c.bf16 %v2762_v28, %v2762_v28 }
 0x841   : > { %v2780_v22 = vpack.c.bf16 %v2778_v1, %v2777_v37 }
 0x842   : > { %v2792_v32 = vsel %vm775_vm8, %v2781_v11, 0 }
 0x843   : > { %3290 = vmatpush3.bf16.msra.mxu1 %v2780_v22 }
 0x844   : > { %3291 = vmatprep.subr.bf16.mxu1 %v5724_v49 }
 0x847   : > { %3292 = vmatpush3.bf16.msra.mxu1 %v2792_v32 }
 0x84a   : > { %3294 = vmatmul.mubr.msk.bf16.vlgmr.msra.gmra.mrb[36].mxu1 %vm1340_vm9, %v2782_v16 }
 0x850   : > { %v2786_v5 = vpop.permute.xlu0 %2785 }
 0x91d   : > { %v2828_v14 = vpop.f32.mrb[36].mxu1 }
 0x91e   : > { %v2829_v17 = vadd.f32 %v2828_v14, %v2786_v5  ;;  %v3295_v23 = vpop.f32.mrb[37].mxu1 }
 0x91f   : > { %v2831_v26 = vpop.f32.mrb[38].mxu1 }
 0x920   : > { %v2834_v59 = vmax.f32 %v2829_v17, 0.0  ;;  %v3296_v8 = vpop.f32.mrb[39].mxu1 }
 0x922   : > { %2837 = vrot.lane.b32.xlu0 %v2834_v59, %s3975_s25  ;;  %2835 = vrot.lane.b32.xlu1 %v2834_v59, %s3976_s30  ;;  %s391_s25 = scalar_lea.vmem [#allocation5], %s390_s29 }
 0x923   : > { %s2976_s30 = sshll.u32 %s391_s25, 4  ;;  %s5655_s30 = int_to_ptr.vmem [resolvable:$true] %s2976_s30 }
 0x926   : > { %2841 = vrot.lane.b32.xlu0 %v2834_v59, %s3989_s22  ;;  %2839 = vrot.lane.b32.xlu1 %v2834_v59, %s3987_s12  ;;  %s5653_s22 = scalar_lea.hbm %s5706_s11, %s3129_s13 }
 0x92a   : > { %2845 = vrot.lane.b32.xlu0 %v2834_v59, %s3992_s26  ;;  %2843 = vrot.lane.b32.xlu1 %v2834_v59, %s3988_s16  ;;  %s3908_s26 = sshll.u32 %s3993_s21, 4  ;;  %s3909_s26 = int_to_ptr.vmem [resolvable:$false] %s3908_s26 }
 0x92b   : > { %s3910_s14 = scalar_lea.vmem %s3909_s26, 32  ;;  %p3911_p2 = scmp.lt.s32.totalorder %s5655_s30, %s3909_s26 }
 0x92e   : > { %2849 = vrot.lane.b32.xlu0 %v2834_v59, %s3991_s24  ;;  %2847 = vrot.lane.b32.xlu1 %v2834_v59, %s3990_s15  ;;  %s2964_s15 = scalar_lea.sflag [#allocation4], %s390_s29  ;;  %s3904_s24 = scalar_lea.vmem %s5655_s30, 16 }
 0x92f   : > { %p3905_p6 = scmp.ne.s32.totalorder %s5655_s30, %s3904_s24  ;;  %p3912_p3 = scmp.lt.s32.totalorder %s3910_s14, %s3904_s24 }
 0x931   : > { %p3906_p10 = pnand %p3905_p6, %p5726_p9  ;;  %p3913_p4 = por %p3912_p3, %p3911_p2 }
 0x932   : > { %2865 = vperm.xlu0 %3502, %v404_v3   ;;  %2860 = vperm.xlu1 %3743, %v403_v46  }
 0x933   : > { %p3907_p12 = pneg %p3906_p10 }
 0x935   : > { %p3914_p7 = pnand %p3913_p4, %p3907_p12 }
 0x994   : > { %v2838_v43 = vpop.permute.xlu0 %2837  ;;  %v2836_v20 = vpop.permute.xlu1 %2835 }
 0x995   : > { %v2851_v52 = vpack.c.bf16 %v2836_v20, %v2834_v59 }
 0x997   : > { %3298 = vmatpush3.bf16.msra.mxu0 %v2851_v52 }
 0x998   : > { %v2842_v41 = vpop.permute.xlu0 %2841  ;;  %v2840_v44 = vpop.permute.xlu1 %2839  ;;  %3299 = vmatprep.subr.bf16.mxu0 %v5724_v49 }
 0x999   : > { %v2852_v9 = vpack.c.bf16 %v2840_v44, %v2838_v43 }
 0x99b   : > { %3300 = vmatpush3.bf16.msra.mxu0 %v2852_v9 }
 0x99c   : > { %v2846_v56 = vpop.permute.xlu0 %2845  ;;  %v2844_v50 = vpop.permute.xlu1 %2843  ;;  %3301 = vmatprep.subr.bf16.mxu0 %v5724_v49 }
 0x99d   : > { %v2853_v13 = vpack.c.bf16 %v2844_v50, %v2842_v41 }
 0x99f   : > { %3302 = vmatpush3.bf16.msra.mxu0 %v2853_v13 }
 0x9a0   : > { %v2850_v51 = vpop.permute.xlu0 %2849  ;;  %v2848_v31 = vpop.permute.xlu1 %2847  ;;  %3303 = vmatprep.subr.bf16.mxu0 %v5724_v49 }
 0x9a1   : > { %v2854_v60 = vpack.c.bf16 %v2848_v31, %v2846_v56  ;;  %v2855_v42 = vpack.c.bf16 %v2850_v51, %v2850_v51 }
 0x9a3   : > { %3304 = vmatpush3.bf16.msra.mxu0 %v2854_v60  ;;  %v2877_v63 = vsel %vm791_vm7, %v2855_v42, 0 }
 0x9a4   : > { %3305 = vmatprep.subr.bf16.mxu0 %v5724_v49 }
 0x9a7   : > { %3306 = vmatpush3.bf16.msra.mxu0 %v2877_v63 }
 0x9aa   : > { %3308 = vmatmul.mubr.msk.bf16.vlgmr.msra.gmra.mrb[32].mxu0 %vm1755_vm11, %v3871_v30 }
 0x9b1   : > { %v2861_v0 = vpop.permute.xlu1 %2860  ;;  %v2866_v40 = vpop.permute.xlu0 %2865 }
 0xa7d   : > { %v2913_v21 = vpop.f32.mrb[32].mxu0 }
 0xa7e   : > { %v2914_v45 = vadd.f32 %v2913_v21, %v2861_v0  ;;  %v3309_v58 = vpop.f32.mrb[33].mxu0 }
 0xa7f   : > { %v2916_v55 = vpop.f32.mrb[34].mxu0 }
 0xa80   : > { %v2920_v49 = vmax.f32 %v2914_v45, 0.0  ;;  %v2917_v29 = vadd.f32 %v2916_v55, %v2866_v40  ;;  %v3310_v18 = vpop.f32.mrb[35].mxu0 }
 0xa82   : > { %v2929_v6 = vmul.f32 %v3128_v35, %v2920_v49  ;;  %v2921_v48 = vmax.f32 %v2917_v29, 0.0 }
 0xa84   : > { %v2930_v15 = vmul.f32 %v3128_v35, %v2921_v48  ;;  %2931 = vadd.xlane.f32.xlu1 %v2929_v6 }
 0xa86   : > { %2933 = vadd.xlane.f32.xlu0 %v2930_v15 }
 0xb11   : > { %v2932_v36 = vpop.xlane.xlu1 %2931 }
 0xb12   : > { %v2937_v25 = vmul.f32 %v2935_v34, %v2932_v36 }
 0xb13   : > { %v2934_v4 = vpop.xlane.xlu0 %2933 }
 0xb14   : > { %v2938_v12 = vmul.f32 %v2936_v19, %v2934_v4  ;;  %v2940_v57 = vsel %vm2939_vm1, %v2937_v25, 0.0 }
 0xb16   : > { %v2941_v47 = vsel %vm2939_vm1, %v2938_v12, 0.0 }
 0xb17   : > { %v2942_v27 = vadd.f32 %v2941_v47, %v2940_v57 }
 0xb19   : > { %v2943_v61 = vrot.slane %v2942_v27, 4 }
 0xb1b   : > { %v2944_v62 = vadd.f32 %v2943_v61, %v2942_v27 }
 0xb1d   : > { %v2945_v38 = vrot.slane %v2944_v62, 2 }
 0xb1f   : > { %v2946_v24 = vadd.f32 %v2945_v38, %v2944_v62 }
 0xb21   : > { %v2947_v2 = vrot.slane %v2946_v24, 1 }
 0xb23   : > { %v2948_v39 = vadd.f32 %v2947_v2, %v2946_v24 }
 0xb25   : > { %v2949_v53 = vsel %vm2939_vm1, %v2948_v39, -inf }
 0xb26   : > { %2950 = vmax.xlane.f32.xlu0 %v2949_v53 }
 0xbb3   : > { %v2951_v33 = vpop.xlane.xlu0 %2950 }
 0xbb4   : > { %v2952_v10 = vsub.f32 %v2948_v39, %v2951_v33 }
 0xbb6   : > { %v2953_v7 = vmul.f32 1.442695, %v2952_v10 }
 0xbb8   : > { %3872 = vpow2.f32 %v2953_v7 }
 0xbc2   : > { %v3873_v28 = vpop.eup %3872 }
 0xbc3   : > { %v2955_v54 = vsel %vm2939_vm1, %v3873_v28, 0.0 }
 0xbc4   : > { %2956 = vadd.xlane.f32.xlu1 %v2955_v54 }
 0xc51   : > { %v2957_v37 = vpop.xlane.xlu1 %2956 }
 0xc52   : > { %3874 = vlog2.f32 %v2957_v37 }
 0xc5c   : > { %v3875_v1 = vpop.eup %3874 }
 0xc5d   : > { %v2959_v22 = vmul.f32 0.6931472, %v3875_v1 }
 0xc5f   : > { %v2960_v11 = vsub.f32 %v2952_v10, %v2959_v22 }
 0xc61   : > { %2962 = vst.msk [vmem:[%s391_s25] sm:$0x1] %vm2961_vm3, %v2960_v11 }
 0xc62   : > { %3917 = shalt.err (!%p3914_p7)
}
 0xc63   : > { %s3918_s29 = scalar_lea.hbm %s5653_s22, 16  ;;  %s3922_s12 = scalar_lea.hbm %s5706_s11, 32 }
 0xc64   : > { %p3919_p8 = scmp.ne.s32.totalorder %s5653_s22, %s3918_s29  ;;  %p3923_p1 = scmp.lt.u32.totalorder %s5653_s22, %s5706_s11 }
 0xc65   : > { %p3924_p0 = scmp.lt.u32.totalorder %s3922_s12, %s3918_s29  ;;  %p3926_p6 = scmp.lt.u32.totalorder %s3918_s29, %s5653_s22 }
 0xc66   : > { %p3920_p11 = pnand %p3919_p8, %p5726_p9 }
 0xc67   : > { %p3925_p5 = por %p3924_p0, %p3923_p1 }
 0xc68   : > { %p3921_p13 = pneg %p3920_p11 }
 0xc69   : > { %p3927_p10 = por %p3926_p6, %p3925_p5 }
 0xc6b   : > { %p3928_p12 = pnand %p3927_p10, %p3921_p13 }
 0xc6d   : > { %3931 = shalt.err (!%p3928_p12)
}
 0xc6e   : > { %3316 = dma.vmem_to_hbm [thread:$0]  (%p5726_p9), %s5655_s30, 16, %s5653_s22, %s2964_s15  }
 0xc6f PF: > { %p3328_p2 = scmp.ge.s32.totalorder %s3970_s20, 2  ;;  %s2988_s24 = sand.u32 1, %s3958_s17  }
 0xc70   : > { %p5727_p3 = scmp.ne.s32.totalorder %s5717_s28, 0  ;;  %s2989_s26 = scalar_lea.sflag [#allocation4], %s2988_s24 }
 0xc72   : > { %p3323_p4 = pnand %p3328_p2, %p5727_p3 }
 0xc74   : > { %3953 = dma.done.wait (!%p3323_p4), %s2989_s26, 16  }
 0xc75   : > { %3955 = vsyncadd (!%p3323_p4), %s2989_s26, 4294967280  ;;  %s5728_s14 = sld [smem:[#allocation8_spill]]  ;;  %p22_p7 = scmp.ge.s32.totalorder %s4079_s23, 4  }
 0xc76   : > { %s5729_s17 = smov %s3962_s18  ;;  %s5730_s18 = smov %s3966_s19 }
 0xc77   : > { %s5732_s20 = smov %s4079_s23  ;;  %24 = sbr.rel (!%p22_p7) target bundleno = 4 (0x4), region = 104 }
 0xc7b   : > { %s5731_s19 = smov %s5728_s14 }
 0xc7e   :  { %2993 = vsyncpa [#allocation3], 1 }
 0xc7f   :  { %2995 = vsyncpa [#allocation3 + $0x1], 1 }
 0xc80   :  { %2996 = vsyncpa [#allocation4], 1 }
 0xc81   :  { %2998 = vsyncpa [#allocation4 + $0x1], 1 }

</bundles_post_ra>
